<compile_context>
chip_gen: v6e
topology: v6e:2x2x1
jax: 0.10.0
libtpu: 0.0.40
codegen_flags: <defaults>
</compile_context>

<pallas_src>
import jax
import jax.numpy as jnp
from jax import lax
from jax.experimental import pallas as pl
from jax.experimental.pallas import tpu as pltpu


def _self_attention_kernel(xq_ref, xf_ref, wq_ref, bq_ref, wk_ref, bk_ref,
                           wv_ref, bv_ref, gamma_ref, o_ref, kT_sc, v_sc):
    """One (batch, query-tile) grid step of SelfAttention."""
    qi = pl.program_id(1)

    # K^T (Cq, N) and V (N, C) for this batch sample are computed once, at the
    # first query tile; they persist in VMEM scratch for all later tiles.
    @pl.when(qi == 0)
    def _():
        xf = xf_ref[0]                                        # (N, C)
        # K^T = Wk (Cq, C) contracted with xf (N, C) over C  -> A @ B^T form.
        kT_sc[...] = lax.dot_general(
            wk_ref[...], xf, (((1,), (1,)), ((), ())),
            preferred_element_type=jnp.float32) + bk_ref[...]
        # V = xf (N, C) contracted with Wv (C, C) over C      -> A @ B^T form.
        v_sc[...] = lax.dot_general(
            xf, wv_ref[...], (((1,), (1,)), ((), ())),
            preferred_element_type=jnp.float32) + bv_ref[...]

    xq = xq_ref[0]                                            # (TQ, C)
    # Q tile = xq @ Wq^T + bq -> (TQ, Cq)
    q = lax.dot_general(
        xq, wq_ref[...], (((1,), (1,)), ((), ())),
        preferred_element_type=jnp.float32) + bq_ref[...]

    # energy[i, j] = q_i . k_j -> (TQ, N); softmax over keys (lane axis).
    energy = jnp.dot(q, kT_sc[...], preferred_element_type=jnp.float32)
    m = jnp.max(energy, axis=-1, keepdims=True)
    p = jnp.exp(energy - m)
    denom = jnp.sum(p, axis=-1, keepdims=True)
    attn = p / denom   # exact; pl.reciprocal(denom, approx=True) is a perf option

    # out = attn @ V -> (TQ, C); gamma-scaled residual, single lane-dense store.
    out = jnp.dot(attn, v_sc[...], preferred_element_type=jnp.float32)
    o_ref[0] = (gamma_ref[...] * out + xq.astype(jnp.float32)).astype(o_ref.dtype)


def self_attention_forward(x, wq, bq, wk, bk, wv, bv, gamma, *, query_tile=128):
    """x: (B, C, H, W).  Conv1x1 weights in PyTorch (out, in) layout."""
    B, C, H, W = x.shape
    N = H * W
    Cq = wq.shape[0]

    # (B, C, H, W) -> (B, N, C): rows = spatial positions, cols = channels.
    # This activation relayout is the only per-call transpose; weights are
    # consumed in native (out, in) layout via trans_b matmuls in the kernel.
    x_nc = jnp.transpose(x.reshape(B, C, N), (0, 2, 1))

    TQ = query_tile if (N % query_tile == 0) else N   # fall back to one tile
    grid = (B, N // TQ)

    out_nc = pl.pallas_call(
        _self_attention_kernel,
        out_shape=jax.ShapeDtypeStruct((B, N, C), x.dtype),
        grid_spec=pltpu.PrefetchScalarGridSpec(
            num_scalar_prefetch=0,
            grid=grid,
            in_specs=[
                # query / residual tile
                pl.BlockSpec((1, TQ, C), lambda b, qi: (b, qi, 0)),
                # full x for this batch sample (K/V source); block index only
                # changes with b, so it is DMA'd once per batch, not per tile.
                pl.BlockSpec((1, N, C), lambda b, qi: (b, 0, 0)),
                pl.BlockSpec((Cq, C), lambda b, qi: (0, 0)),   # Wq (out, in)
                pl.BlockSpec((1, Cq), lambda b, qi: (0, 0)),   # bq
                pl.BlockSpec((Cq, C), lambda b, qi: (0, 0)),   # Wk (out, in)
                pl.BlockSpec((Cq, 1), lambda b, qi: (0, 0)),   # bk
                pl.BlockSpec((C, C), lambda b, qi: (0, 0)),    # Wv (out, in)
                pl.BlockSpec((1, C), lambda b, qi: (0, 0)),    # bv
                pl.BlockSpec((1, 1), lambda b, qi: (0, 0)),    # gamma
            ],
            out_specs=pl.BlockSpec((1, TQ, C), lambda b, qi: (b, qi, 0)),
            scratch_shapes=[
                pltpu.VMEM((Cq, N), jnp.float32),   # K^T, resident per batch
                pltpu.VMEM((N, C), jnp.float32),    # V,   resident per batch
            ],
        ),
        compiler_params=pltpu.CompilerParams(
            dimension_semantics=("parallel", "arbitrary"),
        ),
    )(x_nc, x_nc, wq, bq.reshape(1, Cq), wk, bk.reshape(Cq, 1),
      wv, bv.reshape(1, C), gamma.reshape(1, 1))

    # (B, N, C) -> (B, C, H, W)
    return jnp.transpose(out_nc, (0, 2, 1)).reshape(B, C, H, W)


def feature_shifter_sa_forward(x, layer_params):
    """FeatureShifter_SA forward: sequential SelfAttention layers."""
    # TODO(synk): the conv_layers > 0 branch (Conv2d 5x5 + BatchNorm2d + ReLU)
    # is not translated; the module's default config (conv_layers=0) is pure
    # stacked SelfAttention, which is what this implements.
    for p in layer_params:
        x = self_attention_forward(x, *p)
    return x


def init_self_attention_params(key, input_nc, dtype=jnp.float32):
    """Mimics nn.Conv2d(k=1) default init: U(-1/sqrt(fan_in), 1/sqrt(fan_in))."""
    output_nc = max(input_nc // 8, 1)
    kq, kbq, kk, kbk, kv, kbv, kg = jax.random.split(key, 7)
    bound = 1.0 / jnp.sqrt(jnp.asarray(input_nc, dtype))
    wq = jax.random.uniform(kq, (output_nc, input_nc), dtype, -bound, bound)
    bq = jax.random.uniform(kbq, (output_nc,), dtype, -bound, bound)
    wk = jax.random.uniform(kk, (output_nc, input_nc), dtype, -bound, bound)
    bk = jax.random.uniform(kbk, (output_nc,), dtype, -bound, bound)
    wv = jax.random.uniform(kv, (input_nc, input_nc), dtype, -bound, bound)
    bv = jax.random.uniform(kbv, (input_nc,), dtype, -bound, bound)
    gamma = jax.random.normal(kg, (1,), dtype)              # torch.randn(1)
    return (wq, bq, wk, bk, wv, bv, gamma)


def init_feature_shifter_sa_params(key, input_nc, n_layers=1, dtype=jnp.float32):
    keys = jax.random.split(key, n_layers)
    return [init_self_attention_params(k, input_nc, dtype) for k in keys]


# ----------------------- plain-JAX reference (for checking) -----------------
def _self_attention_reference(x, wq, bq, wk, bk, wv, bv, gamma):
    B, C, H, W = x.shape
    N = H * W
    hp = lax.Precision.HIGHEST
    x_cn = x.reshape(B, C, N)
    q = jnp.einsum('oc,bcn->bon', wq, x_cn, precision=hp) + bq[None, :, None]
    k = jnp.einsum('oc,bcn->bon', wk, x_cn, precision=hp) + bk[None, :, None]
    v = jnp.einsum('oc,bcn->bon', wv, x_cn, precision=hp) + bv[None, :, None]
    energy = jnp.einsum('bci,bcj->bij', q, k, precision=hp)      # (B, N, N)
    attn = jax.nn.softmax(energy, axis=-1)
    out = jnp.einsum('bcj,bij->bci', v, attn, precision=hp)      # (B, C, N)
    return gamma * out.reshape(B, C, H, W) + x


def _feature_shifter_sa_reference(x, layer_params):
    for p in layer_params:
        x = _self_attention_reference(x, *p)
    return x


if __name__ == "__main__":
    key = jax.random.PRNGKey(0)
    kx, kp = jax.random.split(key)

    # Small shapes consistent with the module: B=2, C=16, H=W=16
    #   -> N = 256 spatial positions, Cq = max(16 // 8, 1) = 2, 2 query tiles.
    B, C, H, W = 2, 16, 16, 16
    x = jax.random.normal(kx, (B, C, H, W), jnp.float32)
    params = init_feature_shifter_sa_params(kp, C, n_layers=1)

    out = feature_shifter_sa_forward(x, params)
    out = jax.block_until_ready(out)

    ref = _feature_shifter_sa_reference(x, params)
    assert out.shape == x.shape
    max_err = float(jnp.max(jnp.abs(out - ref)))
    assert jnp.allclose(out, ref, atol=1e-4, rtol=1e-4), f"max_err={max_err}"

    print("KERNEL_OK")
</pallas_src>

<mosaic_0001>
module attributes {stable_mosaic.version = 11 : i64} {
  func.func @_self_attention_kernel(%arg0: i32, %arg1: i32, %arg2: memref<1x128x16xf32, #tpu.memory_space<vmem>>, %arg3: memref<1x256x16xf32, #tpu.memory_space<vmem>>, %arg4: memref<2x16xf32, #tpu.memory_space<vmem>>, %arg5: memref<1x2xf32, #tpu.memory_space<vmem>>, %arg6: memref<2x16xf32, #tpu.memory_space<vmem>>, %arg7: memref<2x1xf32, #tpu.memory_space<vmem>>, %arg8: memref<16x16xf32, #tpu.memory_space<vmem>>, %arg9: memref<1x16xf32, #tpu.memory_space<vmem>>, %arg10: memref<1x1xf32, #tpu.memory_space<vmem>>, %arg11: memref<1x128x16xf32, #tpu.memory_space<vmem>>, %arg12: memref<2x256xf32, #tpu.memory_space<vmem>>, %arg13: memref<256x16xf32, #tpu.memory_space<vmem>>) attributes {dimension_semantics = [#tpu.dimension_semantics<parallel>, #tpu.dimension_semantics<arbitrary>], iteration_bounds = array<i64: 2, 2>, scalar_prefetch = 0 : i64, scratch_operands = 2 : i64, tpu.core_type = #tpu.core_type<tc>, window_params = [{transform_indices = @transform_0, window_bounds = array<i64: 1, 128, 16>}, {transform_indices = @transform_1, window_bounds = array<i64: 1, 256, 16>}, {pipeline_mode = #tpu.pipeline_mode<synchronous>, transform_indices = @transform_2, window_bounds = array<i64: 2, 16>}, {pipeline_mode = #tpu.pipeline_mode<synchronous>, transform_indices = @transform_3, window_bounds = array<i64: 1, 2>}, {pipeline_mode = #tpu.pipeline_mode<synchronous>, transform_indices = @transform_4, window_bounds = array<i64: 2, 16>}, {pipeline_mode = #tpu.pipeline_mode<synchronous>, transform_indices = @transform_5, window_bounds = array<i64: 2, 1>}, {pipeline_mode = #tpu.pipeline_mode<synchronous>, transform_indices = @transform_6, window_bounds = array<i64: 16, 16>}, {pipeline_mode = #tpu.pipeline_mode<synchronous>, transform_indices = @transform_7, window_bounds = array<i64: 1, 16>}, {pipeline_mode = #tpu.pipeline_mode<synchronous>, transform_indices = @transform_8, window_bounds = array<i64: 1, 1>}, {transform_indices = @transform_9, window_bounds = array<i64: 1, 128, 16>}]} {
    %c0_i32 = arith.constant 0 : i32
    %0 = arith.cmpi eq, %arg1, %c0_i32 : i32
    %1 = arith.extui %0 : i1 to i32
    %c0_i32_0 = arith.constant 0 : i32
    %2 = arith.cmpi ne, %1, %c0_i32_0 : i32
    scf.if %2 {
      %c0_20 = arith.constant 0 : index
      %c0_21 = arith.constant 0 : index
      %c0_22 = arith.constant 0 : index
      %30 = vector.load %arg3[%c0_20, %c0_21, %c0_22] : memref<1x256x16xf32, #tpu.memory_space<vmem>>, vector<1x256x16xf32>
      %31 = vector.shape_cast %30 : vector<1x256x16xf32> to vector<256x16xf32>
      %c0_23 = arith.constant 0 : index
      %c0_24 = arith.constant 0 : index
      %32 = vector.load %arg6[%c0_23, %c0_24] : memref<2x16xf32, #tpu.memory_space<vmem>>, vector<2x16xf32>
      %cst_25 = arith.constant dense<0.000000e+00> : vector<2x256xf32>
      %33 = tpu.matmul %32, %31, %cst_25 {dimension_numbers = #tpu.dot_dimension_numbers<[1], [1], [0], [0], [0, 0, 1, 0], [], []>} : vector<2x16xf32>, vector<256x16xf32>, vector<2x256xf32> -> vector<2x256xf32>
      %c0_26 = arith.constant 0 : index
      %c0_27 = arith.constant 0 : index
      %34 = vector.load %arg7[%c0_26, %c0_27] : memref<2x1xf32, #tpu.memory_space<vmem>>, vector<2x1xf32>
      %35 = vector.broadcast %34 : vector<2x1xf32> to vector<2x256xf32>
      %36 = arith.addf %33, %35 : vector<2x256xf32>
      %c0_28 = arith.constant 0 : index
      %c0_29 = arith.constant 0 : index
      %37 = vector.load %arg12[%c0_28, %c0_29] : memref<2x256xf32, #tpu.memory_space<vmem>>, vector<2x256xf32>
      tpu.vector_store %arg12[%c0_28, %c0_29], %36 {strides = array<i32>} : memref<2x256xf32, #tpu.memory_space<vmem>>, vector<2x256xf32>,
      %c0_30 = arith.constant 0 : index
      %c0_31 = arith.constant 0 : index
      %38 = vector.load %arg8[%c0_30, %c0_31] : memref<16x16xf32, #tpu.memory_space<vmem>>, vector<16x16xf32>
      %cst_32 = arith.constant dense<0.000000e+00> : vector<256x16xf32>
      %39 = tpu.matmul %31, %38, %cst_32 {dimension_numbers = #tpu.dot_dimension_numbers<[1], [1], [0], [0], [0, 0, 1, 0], [], []>} : vector<256x16xf32>, vector<16x16xf32>, vector<256x16xf32> -> vector<256x16xf32>
      %c0_33 = arith.constant 0 : index
      %c0_34 = arith.constant 0 : index
      %40 = vector.load %arg9[%c0_33, %c0_34] : memref<1x16xf32, #tpu.memory_space<vmem>>, vector<1x16xf32>
      %41 = vector.broadcast %40 : vector<1x16xf32> to vector<256x16xf32>
      %42 = arith.addf %39, %41 : vector<256x16xf32>
      %c0_35 = arith.constant 0 : index
      %c0_36 = arith.constant 0 : index
      %43 = vector.load %arg13[%c0_35, %c0_36] : memref<256x16xf32, #tpu.memory_space<vmem>>, vector<256x16xf32>
      tpu.vector_store %arg13[%c0_35, %c0_36], %42 {strides = array<i32>} : memref<256x16xf32, #tpu.memory_space<vmem>>, vector<256x16xf32>,
    } else {
    }
    %c0 = arith.constant 0 : index
    %c0_1 = arith.constant 0 : index
    %c0_2 = arith.constant 0 : index
    %3 = vector.load %arg2[%c0, %c0_1, %c0_2] : memref<1x128x16xf32, #tpu.memory_space<vmem>>, vector<1x128x16xf32>
    %4 = vector.shape_cast %3 : vector<1x128x16xf32> to vector<128x16xf32>
    %c0_3 = arith.constant 0 : index
    %c0_4 = arith.constant 0 : index
    %5 = vector.load %arg4[%c0_3, %c0_4] : memref<2x16xf32, #tpu.memory_space<vmem>>, vector<2x16xf32>
    %cst = arith.constant dense<0.000000e+00> : vector<128x2xf32>
    %6 = tpu.matmul %4, %5, %cst {dimension_numbers = #tpu.dot_dimension_numbers<[1], [1], [0], [0], [0, 0, 1, 0], [], []>} : vector<128x16xf32>, vector<2x16xf32>, vector<128x2xf32> -> vector<128x2xf32>
    %c0_5 = arith.constant 0 : index
    %c0_6 = arith.constant 0 : index
    %7 = vector.load %arg5[%c0_5, %c0_6] : memref<1x2xf32, #tpu.memory_space<vmem>>, vector<1x2xf32>
    %8 = vector.broadcast %7 : vector<1x2xf32> to vector<128x2xf32>
    %9 = arith.addf %6, %8 : vector<128x2xf32>
    %c0_7 = arith.constant 0 : index
    %c0_8 = arith.constant 0 : index
    %10 = vector.load %arg12[%c0_7, %c0_8] : memref<2x256xf32, #tpu.memory_space<vmem>>, vector<2x256xf32>
    %cst_9 = arith.constant dense<0.000000e+00> : vector<128x256xf32>
    %11 = tpu.matmul %9, %10, %cst_9 {dimension_numbers = #tpu.dot_dimension_numbers<[1], [0], [0], [1], [0, 0, 1, 1], [], []>} : vector<128x2xf32>, vector<2x256xf32>, vector<128x256xf32> -> vector<128x256xf32>
    %cst_10 = arith.constant dense<0xFF800000> : vector<128xf32>
    %12 = vector.multi_reduction <maximumf>, %11, %cst_10 [1] : vector<128x256xf32> to vector<128xf32>
    %13 = vector.shape_cast %12 : vector<128xf32> to vector<128x1xf32>
    %14 = vector.broadcast %13 : vector<128x1xf32> to vector<128x256xf32>
    %15 = arith.subf %11, %14 : vector<128x256xf32>
    %16 = math.exp %15 : vector<128x256xf32>
    %cst_11 = arith.constant dense<0.000000e+00> : vector<128xf32>
    %17 = vector.multi_reduction <add>, %16, %cst_11 [1] : vector<128x256xf32> to vector<128xf32>
    %18 = vector.shape_cast %17 : vector<128xf32> to vector<128x1xf32>
    %19 = vector.broadcast %18 : vector<128x1xf32> to vector<128x256xf32>
    %20 = arith.divf %16, %19 : vector<128x256xf32>
    %c0_12 = arith.constant 0 : index
    %c0_13 = arith.constant 0 : index
    %21 = vector.load %arg13[%c0_12, %c0_13] : memref<256x16xf32, #tpu.memory_space<vmem>>, vector<256x16xf32>
    %cst_14 = arith.constant dense<0.000000e+00> : vector<128x16xf32>
    %22 = tpu.matmul %20, %21, %cst_14 {dimension_numbers = #tpu.dot_dimension_numbers<[1], [0], [0], [1], [0, 0, 1, 1], [], []>} : vector<128x256xf32>, vector<256x16xf32>, vector<128x16xf32> -> vector<128x16xf32>
    %c0_15 = arith.constant 0 : index
    %c0_16 = arith.constant 0 : index
    %23 = vector.load %arg10[%c0_15, %c0_16] : memref<1x1xf32, #tpu.memory_space<vmem>>, vector<1x1xf32>
    %24 = vector.broadcast %23 : vector<1x1xf32> to vector<128x16xf32>
    %25 = arith.mulf %24, %22 : vector<128x16xf32>
    %26 = arith.addf %25, %4 : vector<128x16xf32>
    %c0_17 = arith.constant 0 : index
    %c0_18 = arith.constant 0 : index
    %c0_19 = arith.constant 0 : index
    %27 = vector.load %arg11[%c0_17, %c0_18, %c0_19] : memref<1x128x16xf32, #tpu.memory_space<vmem>>, vector<1x128x16xf32>
    %28 = vector.shape_cast %27 : vector<1x128x16xf32> to vector<128x16xf32>
    %29 = vector.shape_cast %26 : vector<128x16xf32> to vector<1x128x16xf32>
    tpu.vector_store %arg11[%c0_17, %c0_18, %c0_19], %29 {strides = array<i32>} : memref<1x128x16xf32, #tpu.memory_space<vmem>>, vector<1x128x16xf32>,
    return
  }
  func.func @transform_0(%arg0: i32, %arg1: i32) -> (i32, i32, i32) {
    %c0_i32 = arith.constant 0 : i32
    %c0_i32_0 = arith.constant 0 : i32
    return %arg0, %arg1, %c0_i32 : i32, i32, i32
  }
  func.func @transform_1(%arg0: i32, %arg1: i32) -> (i32, i32, i32) {
    %c0_i32 = arith.constant 0 : i32
    %c0_i32_0 = arith.constant 0 : i32
    %c0_i32_1 = arith.constant 0 : i32
    return %arg0, %c0_i32, %c0_i32_0 : i32, i32, i32
  }
  func.func @transform_2(%arg0: i32, %arg1: i32) -> (i32, i32) {
    %c0_i32 = arith.constant 0 : i32
    %c0_i32_0 = arith.constant 0 : i32
    %c0_i32_1 = arith.constant 0 : i32
    return %c0_i32, %c0_i32_0 : i32, i32
  }
  func.func @transform_3(%arg0: i32, %arg1: i32) -> (i32, i32) {
    %c0_i32 = arith.constant 0 : i32
    %c0_i32_0 = arith.constant 0 : i32
    %c0_i32_1 = arith.constant 0 : i32
    return %c0_i32, %c0_i32_0 : i32, i32
  }
  func.func @transform_4(%arg0: i32, %arg1: i32) -> (i32, i32) {
    %c0_i32 = arith.constant 0 : i32
    %c0_i32_0 = arith.constant 0 : i32
    %c0_i32_1 = arith.constant 0 : i32
    return %c0_i32, %c0_i32_0 : i32, i32
  }
  func.func @transform_5(%arg0: i32, %arg1: i32) -> (i32, i32) {
    %c0_i32 = arith.constant 0 : i32
    %c0_i32_0 = arith.constant 0 : i32
    %c0_i32_1 = arith.constant 0 : i32
    return %c0_i32, %c0_i32_0 : i32, i32
  }
  func.func @transform_6(%arg0: i32, %arg1: i32) -> (i32, i32) {
    %c0_i32 = arith.constant 0 : i32
    %c0_i32_0 = arith.constant 0 : i32
    %c0_i32_1 = arith.constant 0 : i32
    return %c0_i32, %c0_i32_0 : i32, i32
  }
  func.func @transform_7(%arg0: i32, %arg1: i32) -> (i32, i32) {
    %c0_i32 = arith.constant 0 : i32
    %c0_i32_0 = arith.constant 0 : i32
    %c0_i32_1 = arith.constant 0 : i32
    return %c0_i32, %c0_i32_0 : i32, i32
  }
  func.func @transform_8(%arg0: i32, %arg1: i32) -> (i32, i32) {
    %c0_i32 = arith.constant 0 : i32
    %c0_i32_0 = arith.constant 0 : i32
    %c0_i32_1 = arith.constant 0 : i32
    return %c0_i32, %c0_i32_0 : i32, i32
  }
  func.func @transform_9(%arg0: i32, %arg1: i32) -> (i32, i32, i32) {
    %c0_i32 = arith.constant 0 : i32
    %c0_i32_0 = arith.constant 0 : i32
    return %arg0, %arg1, %c0_i32 : i32, i32, i32
  }
}

</mosaic_0001>

<bundles_post_ra>
// kernel: tpu_custom_call.1
= control target key start
LH: loop header
LB: loop body
LE: loop exit
PB: predicated region body
PF: predicated region fallthrough
CT: control target
= control target key end

     0   :  { %s2567_s11 = smov 0   ;;  %s2569_s12 = smov 0   ;;  %s3248_s0 = inlined_call_operand.vmem [shape: f32[2,256,16], index: 0, kind: input, shape index: {}]   ;;  %s3249_s1 = inlined_call_operand.vmem [shape: f32[2,256,16], index: 1, kind: input, shape index: {}]   ;;  %s3250_s2 = inlined_call_operand.vmem [shape: f32[2,16], index: 2, kind: input, shape index: {}]   ;;  %s3251_s3 = inlined_call_operand.vmem [shape: f32[1,2], index: 3, kind: input, shape index: {}]   ;;  %s3252_s4 = inlined_call_operand.vmem [shape: f32[2,16], index: 4, kind: input, shape index: {}]   ;;  %s3253_s5 = inlined_call_operand.vmem [shape: f32[2,1], index: 5, kind: input, shape index: {}]   ;;  %s3254_s6 = inlined_call_operand.vmem [shape: f32[16,16], index: 6, kind: input, shape index: {}]   ;;  %s3255_s7 = inlined_call_operand.vmem [shape: f32[1,16], index: 7, kind: input, shape index: {}]   ;;  %s3256_s8 = inlined_call_operand.<no memory space> [shape: f32[1,1], index: 8, kind: input, shape index: {}]   ;;  %s3257_s9 = inlined_call_operand.vmem [shape: f32[2,256,16], index: 9, kind: output, shape index: {}]  }
   0x1   :  { %v14_v0 = vstv %s3256_s8  ;;  %s2571_s13 = smov 0   ;;  %s2573_s14 = smov 0  }
   0x2   :  { %15 = vst [vmem:[#allocation4] sm:$0x1] %v14_v0  ;;  %s2575_s15 = smov 0  }
   0x3 LB: > { %s30_s8 = sadd.s32 1, %s2501_s13  ;;  %s33_s16 = sadd.s32 1, %s2505_s14  ;;  %s2509_s15 = sphi %s2575_s15, %s21_s15   ;;  %s2505_s14 = sphi %s2573_s14, %s3261_s14   ;;  %s2501_s13 = sphi %s2571_s13, %s3260_s13   ;;  %s2497_s12 = sphi %s2569_s12, %s3259_s12   ;;  %s2493_s11 = sphi %s2567_s11, %s3258_s11  }
   0x4   : > { %p31_p0 = scmp.ge.s32.totalorder %s30_s8, 2  ;;  %p1919_p1 = scmp.ge.s32.totalorder %s2509_s15, 1 }
   0x5   : > { %p320_p2 = scmp.lt.s32.totalorder %s2509_s15, 5 }
   0x6   : > { %s3263_s8 = smov (%p31_p0, %s30_s8), 0  ;;  %s3265_s16 = smov (!%p31_p0, %s33_s16), %s2505_s14 }
   0x7   : > { %p321_p3 = pnand %p1919_p1, %p320_p2  ;;  %p35_p4 = scmp.ge.s32.totalorder %s3265_s16, 2 }
   0x8   : > { %s1920_s17 = sshll.u32 (!%p321_p3), %s2493_s11, 4  ;;  %p370_p5 = scmp.lt.s32.totalorder (!%p321_p3), %s2497_s12, 1 }
   0x9   : > { %s3267_s16 = smov (%p35_p4, %s3265_s16), 0  ;;  %324 = sbr.rel (%p321_p3) target bundleno = 1264 (0x4f0), region = 56 }
   0xa   : > { %p372_p6 = scmp.lt.s32.totalorder (!%p321_p3), %s1920_s17, 31  ;;  %p1928_p7 = scmp.ne.s32.totalorder (!%p321_p3), %s2493_s11, 0 }
   0xe   : > { %s3269_s12 = smov (!%p370_p5, %s2497_s12), 1  ;;  %s3271_s17 = smov (!%p372_p6, %s1920_s17), 31 }
   0xf   : > { %s1921_s18 = sshll.u32 %s3269_s12, 5  ;;  %s2038_s19 = sshll.u32 %s3269_s12, 8 }
  0x10   : > { %s375_s20 = sadd.s32 %s1921_s18, %s3271_s17  ;;  %s2600_s23 = scalar_lea.vmem %s3249_s1, %s2038_s19 }
  0x11   : > { %s1922_s24 = sshll.u32 %s375_s20, 3  ;;  %397 = sbr.rel (%p1928_p7) target bundleno = 289 (0x121), region = 60 }
  0x12   : > { %s2605_s27 = scalar_lea.vmem %s3248_s0, %s1922_s24  ;;  %s2610_s30 = scalar_lea.vmem %s3257_s9, %s1922_s24 }
  0x16   : > { %v2613_v1 = vld [vmem:[%s2600_s23 + $0xf8] sm:$0xff]  ;;  %vm437_vm0 = vcmask 130048   ;;  %v621_v2 = vld [vmem:[%s3254_s6 + $0x8] sm:$0xff]  ;;  %v2625_v4 = vld [vmem:[%s2600_s23 + $0xf0] sm:$0xff]  ;;  %v2511_v9 = vmov 0  }
  0x17   : > { %v2619_v3 = vld [vmem:[%s2600_s23 + $0x78] sm:$0xff]  ;;  %2039 = vmatprep.subr.msk.mxu0 %vm437_vm0, %v2613_v1  ;;  %2204 = vmatprep.subr.msk.mxu1 %vm437_vm0, %v621_v2  ;;  %v620_v5 = vld [vmem:[%s3254_s6] sm:$0xff]  ;;  %v412_v7 = vld [vmem:[%s2600_s23 + $0x70] sm:$0xff] }
  0x18   : > { %2040 = vmatpush3.xpose.msk.msra.mxu0 %vm437_vm0, %v2619_v3  ;;  %2205 = vmatpush3.xpose.msk.msra.mxu1 %vm437_vm0, %v621_v2  ;;  %v2634_v6 = vld [vmem:[%s2600_s23] sm:$0xff]  ;;  %v2643_v8 = vld [vmem:[%s2600_s23 + $0xe8] sm:$0xff]  ;;  %v2654_v12 = vld [vmem:[%s2600_s23 + $0x10] sm:$0xff] }
  0x19   : > { %2041 = vmatprep.subr.msk.mxu0 %vm437_vm0, %v2625_v4  ;;  %2206 = vmatprep.subr.msk.mxu1 %vm437_vm0, %v620_v5  ;;  %v2648_v10 = vld [vmem:[%s2600_s23 + $0x8] sm:$0xff]  ;;  %v2657_v13 = vld [vmem:[%s2600_s23 + $0xe0] sm:$0xff]  ;;  %v2665_v14 = vld [vmem:[%s2600_s23 + $0x18] sm:$0xff] }
  0x1a   : > { %2208 = vmatprep.mubr.msk.f32.mxu1 %vm437_vm0, %v2634_v6  ;;  %2357 = vset.pattern.permute.xlu0 %v2511_v9  ;;  %v411_v11 = vld [vmem:[%s2600_s23 + $0x68] sm:$0xff]  ;;  %v410_v15 = vld [vmem:[%s2600_s23 + $0x60] sm:$0xff]  ;;  %v2680_v19 = vld [vmem:[%s2600_s23 + $0xd8] sm:$0xff] }
  0x1b   : > { %v402_v16 = vld [vmem:[%s2600_s23 + $0x20] sm:$0xff]  ;;  %v403_v20 = vld [vmem:[%s2600_s23 + $0x28] sm:$0xff]  ;;  %v409_v21 = vld [vmem:[%s2600_s23 + $0x58] sm:$0xff] }
  0x1c   : > { %2042 = vmatpush3.xpose.msk.msra.mxu0 %vm437_vm0, %v412_v7  ;;  %2207 = vmatpush3.xpose.msk.msra.mxu1 %vm437_vm0, %v620_v5  ;;  %v2674_v17 = vld [vmem:[%s3252_s4] sm:$0x3]  ;;  %v404_v22 = vld [vmem:[%s2600_s23 + $0x30] sm:$0xff]  ;;  %v405_v24 = vld [vmem:[%s2600_s23 + $0x38] sm:$0xff] }
  0x1d   : > { %2043 = vmatprep.subr.msk.mxu0 %vm437_vm0, %v2643_v8  ;;  %v431_v18 = vld [vmem:[%s3253_s5] sm:$0x3]  ;;  %2071 = vmatprep.mubr.msk.f32.mxu0 %vm437_vm0, %v2674_v17  ;;  %v424_v23 = vld [vmem:[%s2600_s23 + $0xd0] sm:$0xff]  ;;  %v423_v27 = vld [vmem:[%s2600_s23 + $0xc8] sm:$0xff] }
  0x1e   : > { %434 = vperm.xlu0 %2357, %v431_v18   ;;  %v408_v25 = vld [vmem:[%s2600_s23 + $0x50] sm:$0xff]  ;;  %v406_v26 = vld [vmem:[%s2600_s23 + $0x40] sm:$0xff]  ;;  %v407_v28 = vld [vmem:[%s2600_s23 + $0x48] sm:$0xff] }
  0x1f   : > { %2209 = vmatmul.mubr.msk.f32.vlgmr.msra.gmra.mxu1 %vm437_vm0, %v2648_v10  ;;  %v422_v29 = vld [vmem:[%s2600_s23 + $0xc0] sm:$0xff]  ;;  %v421_v30 = vld [vmem:[%s2600_s23 + $0xb8] sm:$0xff]  ;;  %v420_v31 = vld [vmem:[%s2600_s23 + $0xb0] sm:$0xff] }
  0x20   : > { %2044 = vmatpush3.xpose.msk.msra.mxu0 %vm437_vm0, %v411_v11  ;;  %2211 = vmatprep.mubr.msk.f32.mxu1 %vm437_vm0, %v2654_v12  ;;  %v414_v32 = vld [vmem:[%s2600_s23 + $0x80] sm:$0xff]  ;;  %v419_v33 = vld [vmem:[%s2600_s23 + $0xa8] sm:$0xff]  ;;  %v416_v35 = vld [vmem:[%s2600_s23 + $0x90] sm:$0xff] }
  0x21   : > { %2045 = vmatprep.subr.msk.mxu0 %vm437_vm0, %v2657_v13  ;;  %v415_v34 = vld [vmem:[%s2600_s23 + $0x88] sm:$0xff]  ;;  %v418_v36 = vld [vmem:[%s2600_s23 + $0xa0] sm:$0xff]  ;;  %v417_v37 = vld [vmem:[%s2600_s23 + $0x98] sm:$0xff] }
  0x22   : > { %v2773_v38 = vld [vmem:[%s3255_s7] ss:$0 sm:$0xff] }
  0x23   : > { %2212 = vmatmul.mubr.msk.f32.gmra.mxu1 %vm437_vm0, %v2665_v14 }
  0x24   : > { %2046 = vmatpush3.xpose.msk.msra.mxu0 %vm437_vm0, %v410_v15  ;;  %2214 = vmatprep.mubr.msk.f32.mxu1 %vm437_vm0, %v402_v16 }
  0x25   : > { %2047 = vmatprep.subr.msk.mxu0 %vm437_vm0, %v2680_v19 }
  0x27   : > { %2215 = vmatmul.mubr.msk.f32.gmra.mxu1 %vm437_vm0, %v403_v20 }
  0x28   : > { %2048 = vmatpush3.xpose.msk.msra.mxu0 %vm437_vm0, %v409_v21  ;;  %2217 = vmatprep.mubr.msk.f32.mxu1 %vm437_vm0, %v404_v22 }
  0x29   : > { %2049 = vmatprep.subr.msk.mxu0 %vm437_vm0, %v424_v23 }
  0x2b   : > { %2218 = vmatmul.mubr.msk.f32.gmra.mxu1 %vm437_vm0, %v405_v24 }
  0x2c   : > { %2050 = vmatpush3.xpose.msk.msra.mxu0 %vm437_vm0, %v408_v25  ;;  %2220 = vmatprep.mubr.msk.f32.mxu1 %vm437_vm0, %v406_v26 }
  0x2d   : > { %2051 = vmatprep.subr.msk.mxu0 %vm437_vm0, %v423_v27 }
  0x2f   : > { %2221 = vmatmul.mubr.msk.f32.gmra.mxu1 %vm437_vm0, %v407_v28 }
  0x30   : > { %2052 = vmatpush3.xpose.msk.msra.mxu0 %vm437_vm0, %v407_v28  ;;  %2223 = vmatprep.mubr.msk.f32.mxu1 %vm437_vm0, %v408_v25 }
  0x31   : > { %2053 = vmatprep.subr.msk.mxu0 %vm437_vm0, %v422_v29 }
  0x33   : > { %2224 = vmatmul.mubr.msk.f32.gmra.mxu1 %vm437_vm0, %v409_v21 }
  0x34   : > { %2054 = vmatpush3.xpose.msk.msra.mxu0 %vm437_vm0, %v406_v26  ;;  %2226 = vmatprep.mubr.msk.f32.mxu1 %vm437_vm0, %v410_v15 }
  0x35   : > { %2055 = vmatprep.subr.msk.mxu0 %vm437_vm0, %v421_v30 }
  0x37   : > { %2227 = vmatmul.mubr.msk.f32.gmra.mxu1 %vm437_vm0, %v411_v11 }
  0x38   : > { %2056 = vmatpush3.xpose.msk.msra.mxu0 %vm437_vm0, %v405_v24  ;;  %2229 = vmatprep.mubr.msk.f32.mxu1 %vm437_vm0, %v412_v7 }
  0x39   : > { %2057 = vmatprep.subr.msk.mxu0 %vm437_vm0, %v420_v31 }
  0x3b   : > { %2230 = vmatmul.mubr.msk.f32.gmra.mxu1 %vm437_vm0, %v2619_v3 }
  0x3c   : > { %2058 = vmatpush3.xpose.msk.msra.mxu0 %vm437_vm0, %v404_v22  ;;  %2232 = vmatprep.mubr.msk.f32.mxu1 %vm437_vm0, %v414_v32 }
  0x3d   : > { %2059 = vmatprep.subr.msk.mxu0 %vm437_vm0, %v419_v33 }
  0x3f   : > { %2233 = vmatmul.mubr.msk.f32.gmra.mxu1 %vm437_vm0, %v415_v34 }
  0x40   : > { %2060 = vmatpush3.xpose.msk.msra.mxu0 %vm437_vm0, %v403_v20  ;;  %2235 = vmatprep.mubr.msk.f32.mxu1 %vm437_vm0, %v416_v35 }
  0x41   : > { %2061 = vmatprep.subr.msk.mxu0 %vm437_vm0, %v418_v36 }
  0x43   : > { %2236 = vmatmul.mubr.msk.f32.gmra.mxu1 %vm437_vm0, %v417_v37 }
  0x44   : > { %2062 = vmatpush3.xpose.msk.msra.mxu0 %vm437_vm0, %v402_v16  ;;  %2238 = vmatprep.mubr.msk.f32.mxu1 %vm437_vm0, %v418_v36 }
  0x45   : > { %2063 = vmatprep.subr.msk.mxu0 %vm437_vm0, %v417_v37 }
  0x47   : > { %2239 = vmatmul.mubr.msk.f32.gmra.mxu1 %vm437_vm0, %v419_v33 }
  0x48   : > { %2064 = vmatpush3.xpose.msk.msra.mxu0 %vm437_vm0, %v2665_v14  ;;  %2241 = vmatprep.mubr.msk.f32.mxu1 %vm437_vm0, %v420_v31 }
  0x49   : > { %2065 = vmatprep.subr.msk.mxu0 %vm437_vm0, %v416_v35 }
  0x4b   : > { %2242 = vmatmul.mubr.msk.f32.gmra.mxu1 %vm437_vm0, %v421_v30 }
  0x4c   : > { %2066 = vmatpush3.xpose.msk.msra.mxu0 %vm437_vm0, %v2654_v12  ;;  %2244 = vmatprep.mubr.msk.f32.mxu1 %vm437_vm0, %v422_v29 }
  0x4d   : > { %2067 = vmatprep.subr.msk.mxu0 %vm437_vm0, %v415_v34 }
  0x4f   : > { %2245 = vmatmul.mubr.msk.f32.gmra.mxu1 %vm437_vm0, %v423_v27 }
  0x50   : > { %2068 = vmatpush3.xpose.msk.msra.mxu0 %vm437_vm0, %v2648_v10  ;;  %2247 = vmatprep.mubr.msk.f32.mxu1 %vm437_vm0, %v424_v23 }
  0x51   : > { %2069 = vmatprep.subr.msk.mxu0 %vm437_vm0, %v414_v32 }
  0x53   : > { %2248 = vmatmul.mubr.msk.f32.gmra.mxu1 %vm437_vm0, %v2680_v19 }
  0x54   : > { %2070 = vmatpush3.xpose.msk.msra.mxu0 %vm437_vm0, %v2634_v6  ;;  %2250 = vmatprep.mubr.msk.f32.mxu1 %vm437_vm0, %v2657_v13 }
  0x57   : > { %2072 = vmatmul.mubr.msk.f32.vlgmr.msra.gmra.mxu0 %vm437_vm0, %v2674_v17  ;;  %2251 = vmatmul.mubr.msk.f32.gmra.mxu1 %vm437_vm0, %v2643_v8 }
  0x58   : > { %2253 = vmatprep.mubr.msk.f32.mxu1 %vm437_vm0, %v2625_v4 }
  0x5b   : > { %2254 = vmatmul.mubr.msk.f32.gmra.mxu1 %vm437_vm0, %v2613_v1 }
  0x99   : > { %v435_v30 = vpop.permute.xlu0 %434 }
  0xdf   : > { %v2210_v39 = vpop.f32.mrf.mxu1 }
  0xe0   : > { %v707_v40 = vadd.f32 %v2210_v39, %v2773_v38 }
  0xe1   : > { %v701_v41 = vpop.f32.mrf.mxu1 }
  0xe2   : > { %861 = vst.msk [vmem:[#allocation3 + $0x8] sm:$0xff] %vm437_vm0, %v707_v40  ;;  %v702_v42 = vadd.f32 %v2773_v38, %v701_v41 }
  0xe3   : > { %v2213_v43 = vpop.f32.mrf.mxu1 }
  0xe4   : > { %860 = vst.msk [vmem:[#allocation3] sm:$0xff] %vm437_vm0, %v702_v42  ;;  %v717_v44 = vadd.f32 %v2213_v43, %v2773_v38 }
  0xe5   : > { %v711_v45 = vpop.f32.mrf.mxu1 }
  0xe6   : > { %863 = vst.msk [vmem:[#allocation3 + $0x18] sm:$0xff] %vm437_vm0, %v717_v44  ;;  %v712_v46 = vadd.f32 %v2773_v38, %v711_v45 }
  0xe7   : > { %v2216_v47 = vpop.f32.mrf.mxu1 }
  0xe8   : > { %862 = vst.msk [vmem:[#allocation3 + $0x10] sm:$0xff] %vm437_vm0, %v712_v46  ;;  %v727_v48 = vadd.f32 %v2216_v47, %v2773_v38 }
  0xe9   : > { %v721_v49 = vpop.f32.mrf.mxu1 }
  0xea   : > { %865 = vst.msk [vmem:[#allocation3 + $0x28] sm:$0xff] %vm437_vm0, %v727_v48  ;;  %v722_v50 = vadd.f32 %v2773_v38, %v721_v49 }
  0xeb   : > { %v2219_v51 = vpop.f32.mrf.mxu1 }
  0xec   : > { %864 = vst.msk [vmem:[#allocation3 + $0x20] sm:$0xff] %vm437_vm0, %v722_v50  ;;  %v737_v52 = vadd.f32 %v2219_v51, %v2773_v38 }
  0xed   : > { %v731_v53 = vpop.f32.mrf.mxu1 }
  0xee   : > { %867 = vst.msk [vmem:[#allocation3 + $0x38] sm:$0xff] %vm437_vm0, %v737_v52  ;;  %v732_v54 = vadd.f32 %v2773_v38, %v731_v53 }
  0xef   : > { %v2222_v55 = vpop.f32.mrf.mxu1 }
  0xf0   : > { %866 = vst.msk [vmem:[#allocation3 + $0x30] sm:$0xff] %vm437_vm0, %v732_v54  ;;  %v747_v56 = vadd.f32 %v2222_v55, %v2773_v38 }
  0xf1   : > { %v741_v57 = vpop.f32.mrf.mxu1 }
  0xf2   : > { %869 = vst.msk [vmem:[#allocation3 + $0x48] sm:$0xff] %vm437_vm0, %v747_v56  ;;  %v742_v58 = vadd.f32 %v2773_v38, %v741_v57 }
  0xf3   : > { %v2225_v59 = vpop.f32.mrf.mxu1 }
  0xf4   : > { %868 = vst.msk [vmem:[#allocation3 + $0x40] sm:$0xff] %vm437_vm0, %v742_v58  ;;  %v757_v60 = vadd.f32 %v2225_v59, %v2773_v38 }
  0xf5   : > { %v751_v61 = vpop.f32.mrf.mxu1 }
  0xf6   : > { %871 = vst.msk [vmem:[#allocation3 + $0x58] sm:$0xff] %vm437_vm0, %v757_v60  ;;  %v752_v62 = vadd.f32 %v2773_v38, %v751_v61 }
  0xf7   : > { %v2228_v63 = vpop.f32.mrf.mxu1 }
  0xf8   : > { %870 = vst.msk [vmem:[#allocation3 + $0x50] sm:$0xff] %vm437_vm0, %v752_v62  ;;  %v767_v0 = vadd.f32 %v2228_v63, %v2773_v38 }
  0xf9   : > { %v761_v1 = vpop.f32.mrf.mxu1 }
  0xfa   : > { %873 = vst.msk [vmem:[#allocation3 + $0x68] sm:$0xff] %vm437_vm0, %v767_v0  ;;  %v762_v2 = vadd.f32 %v2773_v38, %v761_v1 }
  0xfb   : > { %v2231_v3 = vpop.f32.mrf.mxu1 }
  0xfc   : > { %872 = vst.msk [vmem:[#allocation3 + $0x60] sm:$0xff] %vm437_vm0, %v762_v2  ;;  %v777_v4 = vadd.f32 %v2231_v3, %v2773_v38 }
  0xfd   : > { %v771_v5 = vpop.f32.mrf.mxu1 }
  0xfe   : > { %875 = vst.msk [vmem:[#allocation3 + $0x78] sm:$0xff] %vm437_vm0, %v777_v4  ;;  %v772_v6 = vadd.f32 %v2773_v38, %v771_v5 }
  0xff   : > { %v2234_v7 = vpop.f32.mrf.mxu1 }
 0x100   : > { %874 = vst.msk [vmem:[#allocation3 + $0x70] sm:$0xff] %vm437_vm0, %v772_v6  ;;  %v787_v8 = vadd.f32 %v2234_v7, %v2773_v38 }
 0x101   : > { %v781_v9 = vpop.f32.mrf.mxu1 }
 0x102   : > { %877 = vst.msk [vmem:[#allocation3 + $0x88] sm:$0xff] %vm437_vm0, %v787_v8  ;;  %v782_v10 = vadd.f32 %v2773_v38, %v781_v9 }
 0x103   : > { %v2237_v11 = vpop.f32.mrf.mxu1 }
 0x104   : > { %876 = vst.msk [vmem:[#allocation3 + $0x80] sm:$0xff] %vm437_vm0, %v782_v10  ;;  %v797_v12 = vadd.f32 %v2237_v11, %v2773_v38 }
 0x105   : > { %v791_v13 = vpop.f32.mrf.mxu1 }
 0x106   : > { %879 = vst.msk [vmem:[#allocation3 + $0x98] sm:$0xff] %vm437_vm0, %v797_v12  ;;  %v792_v14 = vadd.f32 %v2773_v38, %v791_v13 }
 0x107   : > { %v2240_v15 = vpop.f32.mrf.mxu1 }
 0x108   : > { %878 = vst.msk [vmem:[#allocation3 + $0x90] sm:$0xff] %vm437_vm0, %v792_v14  ;;  %v807_v16 = vadd.f32 %v2240_v15, %v2773_v38 }
 0x109   : > { %v801_v17 = vpop.f32.mrf.mxu1 }
 0x10a   : > { %881 = vst.msk [vmem:[#allocation3 + $0xa8] sm:$0xff] %vm437_vm0, %v807_v16  ;;  %v802_v18 = vadd.f32 %v2773_v38, %v801_v17 }
 0x10b   : > { %v2243_v19 = vpop.f32.mrf.mxu1 }
 0x10c   : > { %880 = vst.msk [vmem:[#allocation3 + $0xa0] sm:$0xff] %vm437_vm0, %v802_v18  ;;  %v817_v20 = vadd.f32 %v2243_v19, %v2773_v38 }
 0x10d   : > { %v811_v21 = vpop.f32.mrf.mxu1 }
 0x10e   : > { %883 = vst.msk [vmem:[#allocation3 + $0xb8] sm:$0xff] %vm437_vm0, %v817_v20  ;;  %v812_v22 = vadd.f32 %v2773_v38, %v811_v21 }
 0x10f   : > { %v2246_v23 = vpop.f32.mrf.mxu1 }
 0x110   : > { %882 = vst.msk [vmem:[#allocation3 + $0xb0] sm:$0xff] %vm437_vm0, %v812_v22  ;;  %v827_v24 = vadd.f32 %v2246_v23, %v2773_v38 }
 0x111   : > { %v821_v25 = vpop.f32.mrf.mxu1 }
 0x112   : > { %885 = vst.msk [vmem:[#allocation3 + $0xc8] sm:$0xff] %vm437_vm0, %v827_v24  ;;  %v822_v26 = vadd.f32 %v2773_v38, %v821_v25 }
 0x113   : > { %v2249_v27 = vpop.f32.mrf.mxu1 }
 0x114   : > { %884 = vst.msk [vmem:[#allocation3 + $0xc0] sm:$0xff] %vm437_vm0, %v822_v26  ;;  %v837_v28 = vadd.f32 %v2249_v27, %v2773_v38 }
 0x115   : > { %v831_v29 = vpop.f32.mrf.mxu1 }
 0x116   : > { %887 = vst.msk [vmem:[#allocation3 + $0xd8] sm:$0xff] %vm437_vm0, %v837_v28  ;;  %v832_v31 = vadd.f32 %v2773_v38, %v831_v29 }
 0x117   : > { %v603_v32 = vpop.f32.mrf.mxu0  ;;  %v2252_v33 = vpop.f32.mrf.mxu1 }
 0x118   : > { %886 = vst.msk [vmem:[#allocation3 + $0xd0] sm:$0xff] %vm437_vm0, %v832_v31  ;;  %v847_v34 = vadd.f32 %v2252_v33, %v2773_v38  ;;  %v604_v35 = vadd.f32 %v603_v32, %v435_v30 }
 0x119   : > { %v605_v36 = vpop.f32.mrf.mxu0  ;;  %v841_v37 = vpop.f32.mrf.mxu1 }
 0x11a   : > { %889 = vst.msk [vmem:[#allocation3 + $0xe8] sm:$0xff] %vm437_vm0, %v847_v34  ;;  %v606_v39 = vadd.f32 %v605_v36, %v435_v30  ;;  %v842_v40 = vadd.f32 %v2773_v38, %v841_v37 }
 0x11b   : > { %v2255_v41 = vpop.f32.mrf.mxu1 }
 0x11c   : > { %v610_v42 = vcombine.low %v604_v35, %v606_v39  ;;  %888 = vst.msk [vmem:[#allocation3 + $0xe0] sm:$0xff] %vm437_vm0, %v842_v40  ;;  %v857_v43 = vadd.f32 %v2255_v41, %v2773_v38 }
 0x11d   : > { %v851_v44 = vpop.f32.mrf.mxu1 }
 0x11e   : > { %1962 = vst.sshfl [vmem:[#allocation2] sm:$0x33 pattern:$0x76325410] %v610_v42  ;;  %891 = vst.msk [vmem:[#allocation3 + $0xf8] sm:$0xff] %vm437_vm0, %v857_v43  ;;  %v852_v45 = vadd.f32 %v2773_v38, %v851_v44 }
 0x120   : > { %890 = vst.msk [vmem:[#allocation3 + $0xf0] sm:$0xff] %vm437_vm0, %v852_v45 }
 0x121 PF: > { %v908_v46 = vld [vmem:[%s3250_s2] sm:$0x3]  ;;  %vm916_vm1 = vcmask 130048   ;;  %v893_v38 = vld [vmem:[%s2605_s27 + $0x8] sm:$0xff]  ;;  %v894_v48 = vld [vmem:[%s2605_s27 + $0x10] sm:$0xff]  ;;  %vm1172_vm2 = vcmask 1041408  }
 0x122   : > { %v892_v47 = vld [vmem:[%s2605_s27] sm:$0xff]  ;;  %2256 = vmatprep.subr.msk.mxu0 %vm916_vm1, %v908_v46  ;;  %v895_v49 = vld [vmem:[%s2605_s27 + $0x18] sm:$0xff]  ;;  %v897_v51 = vld [vmem:[%s2605_s27 + $0x28] sm:$0xff]  ;;  %v2512_v0 = vmov 0.0   ;;  %vm1123_vm3 = vcmask 15360  }
 0x123   : > { %2258 = vmatprep.mubr.msk.f32.mxu0 %vm916_vm1, %v892_v47  ;;  %2257 = vmatpush3.xpose.msk.msra.mxu0 %vm916_vm1, %v908_v46  ;;  %v896_v50 = vld [vmem:[%s2605_s27 + $0x20] sm:$0xff]  ;;  %v898_v52 = vld [vmem:[%s2605_s27 + $0x30] sm:$0xff]  ;;  %v899_v53 = vld [vmem:[%s2605_s27 + $0x38] sm:$0xff] }
 0x124   : > { %v900_v54 = vld [vmem:[%s2605_s27 + $0x40] sm:$0xff]  ;;  %v901_v55 = vld [vmem:[%s2605_s27 + $0x48] sm:$0xff]  ;;  %v902_v56 = vld [vmem:[%s2605_s27 + $0x50] sm:$0xff]  ;;  %1241 = vmatprep.mubr.f32.mxu1 %v2512_v0 }
 0x125   : > { %v903_v57 = vld [vmem:[%s2605_s27 + $0x58] sm:$0xff]  ;;  %v904_v58 = vld [vmem:[%s2605_s27 + $0x60] sm:$0xff]  ;;  %v905_v59 = vld [vmem:[%s2605_s27 + $0x68] sm:$0xff] }
 0x126   : > { %2259 = vmatmul.mubr.msk.f32.vlgmr.msra.gmra.mxu0 %vm916_vm1, %v893_v38  ;;  %v906_v60 = vld [vmem:[%s2605_s27 + $0x70] sm:$0xff]  ;;  %v907_v61 = vld [vmem:[%s2605_s27 + $0x78] sm:$0xff]  ;;  %v2016_v62 = vld.sshfl [vmem:[#allocation2] sm:$0x33 pattern:$0x76325410] }
 0x127   : > { %2261 = vmatprep.mubr.msk.f32.mxu0 %vm916_vm1, %v894_v48  ;;  %v1122_v63 = vcombine.high %v2016_v62, %v2016_v62  ;;  %v1998_v2 = vld [vmem:[%s3251_s3] ss:$0 sm:$0xff] }
 0x129   : > { %2017 = vmatprep.subr.msk.mxu1 %vm1172_vm2, %v1122_v63 }
 0x12a   : > { %2262 = vmatmul.mubr.msk.f32.gmra.mxu0 %vm916_vm1, %v895_v49  ;;  %2018 = vmatpush1.msk.msra.mxu1 %vm1172_vm2, %v2016_v62 }
 0x12b   : > { %2264 = vmatprep.mubr.msk.f32.mxu0 %vm916_vm1, %v896_v50 }
 0x12e   : > { %2265 = vmatmul.mubr.msk.f32.gmra.mxu0 %vm916_vm1, %v897_v51 }
 0x12f   : > { %2267 = vmatprep.mubr.msk.f32.mxu0 %vm916_vm1, %v898_v52 }
 0x132   : > { %2268 = vmatmul.mubr.msk.f32.gmra.mxu0 %vm916_vm1, %v899_v53 }
 0x133   : > { %2270 = vmatprep.mubr.msk.f32.mxu0 %vm916_vm1, %v900_v54 }
 0x136   : > { %2271 = vmatmul.mubr.msk.f32.gmra.mxu0 %vm916_vm1, %v901_v55 }
 0x137   : > { %2273 = vmatprep.mubr.msk.f32.mxu0 %vm916_vm1, %v902_v56 }
 0x13a   : > { %2274 = vmatmul.mubr.msk.f32.gmra.mxu0 %vm916_vm1, %v903_v57 }
 0x13b   : > { %2276 = vmatprep.mubr.msk.f32.mxu0 %vm916_vm1, %v904_v58 }
 0x13e   : > { %2277 = vmatmul.mubr.msk.f32.gmra.mxu0 %vm916_vm1, %v905_v59 }
 0x13f   : > { %2279 = vmatprep.mubr.msk.f32.mxu0 %vm916_vm1, %v906_v60 }
 0x142   : > { %2280 = vmatmul.mubr.msk.f32.gmra.mxu0 %vm916_vm1, %v907_v61 }
 0x1e6   : > { %v2260_v1 = vpop.f32.mrf.mxu0 }
 0x1e7   : > { %v1040_v6 = vadd.f32 %v2260_v1, %v1998_v2 }
 0x1e8   : > { %v1034_v3 = vpop.f32.mrf.mxu0 }
 0x1e9   : > { %v1035_v4 = vadd.f32 %v1998_v2, %v1034_v3 }
 0x1ea   : > { %v2263_v5 = vpop.f32.mrf.mxu0 }
 0x1eb   : > { %2019 = vmatmul.mubr.msk.f32.vlgmr.msra.gmra.mxu1 %vm1123_vm3, %v1035_v4  ;;  %v1050_v10 = vadd.f32 %v2263_v5, %v1998_v2 }
 0x1ec   : > { %1247 = vmatprep.mubr.f32.mxu1 %v2512_v0  ;;  %v1044_v7 = vpop.f32.mrf.mxu0 }
 0x1ed   : > { %v1045_v8 = vadd.f32 %v1998_v2, %v1044_v7 }
 0x1ee   : > { %v2266_v9 = vpop.f32.mrf.mxu0 }
 0x1ef   : > { %2020 = vmatmul.mubr.msk.f32.gmra.mxu1 %vm1123_vm3, %v1040_v6  ;;  %v1060_v14 = vadd.f32 %v2266_v9, %v1998_v2 }
 0x1f0   : > { %1253 = vmatprep.mubr.f32.mxu1 %v2512_v0  ;;  %v1054_v11 = vpop.f32.mrf.mxu0 }
 0x1f1   : > { %v1055_v12 = vadd.f32 %v1998_v2, %v1054_v11 }
 0x1f2   : > { %v2269_v13 = vpop.f32.mrf.mxu0 }
 0x1f3   : > { %2021 = vmatmul.mubr.msk.f32.gmra.mxu1 %vm1123_vm3, %v1045_v8  ;;  %v1070_v18 = vadd.f32 %v2269_v13, %v1998_v2 }
 0x1f4   : > { %1259 = vmatprep.mubr.f32.mxu1 %v2512_v0  ;;  %v1064_v15 = vpop.f32.mrf.mxu0 }
 0x1f5   : > { %v1065_v16 = vadd.f32 %v1998_v2, %v1064_v15 }
 0x1f6   : > { %v2272_v17 = vpop.f32.mrf.mxu0 }
 0x1f7   : > { %2022 = vmatmul.mubr.msk.f32.gmra.mxu1 %vm1123_vm3, %v1050_v10  ;;  %v1080_v22 = vadd.f32 %v2272_v17, %v1998_v2 }
 0x1f8   : > { %1265 = vmatprep.mubr.f32.mxu1 %v2512_v0  ;;  %v1074_v19 = vpop.f32.mrf.mxu0 }
 0x1f9   : > { %v1075_v20 = vadd.f32 %v1998_v2, %v1074_v19  ;;  %v1593_v19 = vld [vmem:[#allocation3 + $0x78] sm:$0xff] }
 0x1fa   : > { %v2275_v21 = vpop.f32.mrf.mxu0 }
 0x1fb   : > { %2023 = vmatmul.mubr.msk.f32.gmra.mxu1 %vm1123_vm3, %v1055_v12  ;;  %v1090_v26 = vadd.f32 %v2275_v21, %v1998_v2  ;;  %v1592_v21 = vld [vmem:[#allocation3 + $0x70] sm:$0xff] }
 0x1fc   : > { %1271 = vmatprep.mubr.f32.mxu1 %v2512_v0  ;;  %v1084_v23 = vpop.f32.mrf.mxu0 }
 0x1fd   : > { %v1085_v24 = vadd.f32 %v1998_v2, %v1084_v23  ;;  %v1591_v23 = vld [vmem:[#allocation3 + $0x68] sm:$0xff] }
 0x1fe   : > { %v2278_v25 = vpop.f32.mrf.mxu0 }
 0x1ff   : > { %2024 = vmatmul.mubr.msk.f32.gmra.mxu1 %vm1123_vm3, %v1060_v14  ;;  %v1100_v30 = vadd.f32 %v2278_v25, %v1998_v2  ;;  %v1590_v25 = vld [vmem:[#allocation3 + $0x60] sm:$0xff] }
 0x200   : > { %1277 = vmatprep.mubr.f32.mxu1 %v2512_v0  ;;  %v1094_v27 = vpop.f32.mrf.mxu0 }
 0x201   : > { %v1095_v28 = vadd.f32 %v1998_v2, %v1094_v27  ;;  %v1589_v27 = vld [vmem:[#allocation3 + $0x58] sm:$0xff] }
 0x202   : > { %v2281_v29 = vpop.f32.mrf.mxu0 }
 0x203   : > { %2025 = vmatmul.mubr.msk.f32.gmra.mxu1 %vm1123_vm3, %v1065_v16  ;;  %v1110_v33 = vadd.f32 %v2281_v29, %v1998_v2  ;;  %v1588_v29 = vld [vmem:[#allocation3 + $0x50] sm:$0xff] }
 0x204   : > { %1283 = vmatprep.mubr.f32.mxu1 %v2512_v0  ;;  %v1104_v31 = vpop.f32.mrf.mxu0 }
 0x205   : > { %v1105_v32 = vadd.f32 %v1998_v2, %v1104_v31  ;;  %v1587_v31 = vld [vmem:[#allocation3 + $0x48] sm:$0xff] }
 0x207   : > { %2026 = vmatmul.mubr.msk.f32.gmra.mxu1 %vm1123_vm3, %v1070_v18  ;;  %v1609_v18 = vld [vmem:[#allocation3 + $0xf8] sm:$0xff] }
 0x208   : > { %1289 = vmatprep.mubr.f32.mxu1 %v2512_v0  ;;  %2124 = vmatprep.subr.mxu0 %v1609_v18 }
 0x209   : > { %2282 = vmatprep.subr.mxu1 %v1609_v18  ;;  %2125 = vmatpush3.msra.mxu0 %v1593_v19 }
 0x20a   : > { %2298 = vmatpush3.msra.mxu1 %v1593_v19 }
 0x20b   : > { %2027 = vmatmul.mubr.msk.f32.gmra.mxu1 %vm1123_vm3, %v1075_v20  ;;  %v1608_v20 = vld [vmem:[#allocation3 + $0xf0] sm:$0xff] }
 0x20c   : > { %1295 = vmatprep.mubr.f32.mxu1 %v2512_v0  ;;  %2126 = vmatprep.subr.mxu0 %v1608_v20 }
 0x20d   : > { %2283 = vmatprep.subr.mxu1 %v1608_v20  ;;  %2127 = vmatpush3.msra.mxu0 %v1592_v21 }
 0x20e   : > { %2299 = vmatpush3.msra.mxu1 %v1592_v21 }
 0x20f   : > { %2028 = vmatmul.mubr.msk.f32.gmra.mxu1 %vm1123_vm3, %v1080_v22  ;;  %v1607_v22 = vld [vmem:[#allocation3 + $0xe8] sm:$0xff] }
 0x210   : > { %1301 = vmatprep.mubr.f32.mxu1 %v2512_v0  ;;  %2128 = vmatprep.subr.mxu0 %v1607_v22 }
 0x211   : > { %2284 = vmatprep.subr.mxu1 %v1607_v22  ;;  %2129 = vmatpush3.msra.mxu0 %v1591_v23 }
 0x212   : > { %2300 = vmatpush3.msra.mxu1 %v1591_v23 }
 0x213   : > { %2029 = vmatmul.mubr.msk.f32.gmra.mxu1 %vm1123_vm3, %v1085_v24  ;;  %v1606_v24 = vld [vmem:[#allocation3 + $0xe0] sm:$0xff] }
 0x214   : > { %1307 = vmatprep.mubr.f32.mxu1 %v2512_v0  ;;  %2130 = vmatprep.subr.mxu0 %v1606_v24 }
 0x215   : > { %2285 = vmatprep.subr.mxu1 %v1606_v24  ;;  %2131 = vmatpush3.msra.mxu0 %v1590_v25 }
 0x216   : > { %2301 = vmatpush3.msra.mxu1 %v1590_v25 }
 0x217   : > { %2030 = vmatmul.mubr.msk.f32.gmra.mxu1 %vm1123_vm3, %v1090_v26  ;;  %v1605_v26 = vld [vmem:[#allocation3 + $0xd8] sm:$0xff] }
 0x218   : > { %1313 = vmatprep.mubr.f32.mxu1 %v2512_v0  ;;  %2132 = vmatprep.subr.mxu0 %v1605_v26 }
 0x219   : > { %2286 = vmatprep.subr.mxu1 %v1605_v26  ;;  %2133 = vmatpush3.msra.mxu0 %v1589_v27 }
 0x21a   : > { %2302 = vmatpush3.msra.mxu1 %v1589_v27 }
 0x21b   : > { %2031 = vmatmul.mubr.msk.f32.gmra.mxu1 %vm1123_vm3, %v1095_v28  ;;  %v1604_v28 = vld [vmem:[#allocation3 + $0xd0] sm:$0xff] }
 0x21c   : > { %1319 = vmatprep.mubr.f32.mxu1 %v2512_v0  ;;  %2134 = vmatprep.subr.mxu0 %v1604_v28 }
 0x21d   : > { %2287 = vmatprep.subr.mxu1 %v1604_v28  ;;  %2135 = vmatpush3.msra.mxu0 %v1588_v29 }
 0x21e   : > { %2303 = vmatpush3.msra.mxu1 %v1588_v29 }
 0x21f   : > { %2032 = vmatmul.mubr.msk.f32.gmra.mxu1 %vm1123_vm3, %v1100_v30  ;;  %v1603_v30 = vld [vmem:[#allocation3 + $0xc8] sm:$0xff] }
 0x220   : > { %1325 = vmatprep.mubr.f32.mxu1 %v2512_v0  ;;  %2136 = vmatprep.subr.mxu0 %v1603_v30 }
 0x221   : > { %2288 = vmatprep.subr.mxu1 %v1603_v30  ;;  %2137 = vmatpush3.msra.mxu0 %v1587_v31 }
 0x222   : > { %2304 = vmatpush3.msra.mxu1 %v1587_v31 }
 0x223   : > { %2033 = vmatmul.mubr.msk.f32.gmra.mxu1 %vm1123_vm3, %v1105_v32  ;;  %v1602_v32 = vld [vmem:[#allocation3 + $0xc0] sm:$0xff] }
 0x224   : > { %1331 = vmatprep.mubr.f32.mxu1 %v2512_v0  ;;  %2138 = vmatprep.subr.mxu0 %v1602_v32 }
 0x225   : > { %2289 = vmatprep.subr.mxu1 %v1602_v32 }
 0x227   : > { %2034 = vmatmul.mubr.msk.f32.gmra.mxu1 %vm1123_vm3, %v1110_v33 }
 0x2ab   : > { %v2911_v34 = vpop.f32.mrf.mxu1 }
 0x2ad   : > { %v2913_v35 = vpop.f32.mrf.mxu1 }
 0x2ae   : > { %v1338_v36 = vmax.f32 %v2911_v34, %v2913_v35 }
 0x2af   : > { %v2917_v37 = vpop.f32.mrf.mxu1 }
 0x2b0   : > { %1339 = vmax.xlane.f32.xlu0 %v1338_v36 }
 0x2b1   : > { %v2919_v39 = vpop.f32.mrf.mxu1 }
 0x2b2   : > { %v1341_v40 = vmax.f32 %v2917_v37, %v2919_v39 }
 0x2b3   : > { %v2923_v41 = vpop.f32.mrf.mxu1 }
 0x2b4   : > { %1342 = vmax.xlane.f32.xlu0 %v1341_v40 }
 0x2b5   : > { %v2925_v42 = vpop.f32.mrf.mxu1 }
 0x2b6   : > { %v1344_v43 = vmax.f32 %v2923_v41, %v2925_v42 }
 0x2b7   : > { %v2929_v44 = vpop.f32.mrf.mxu1 }
 0x2b8   : > { %1345 = vmax.xlane.f32.xlu1 %v1344_v43 }
 0x2b9   : > { %v2931_v45 = vpop.f32.mrf.mxu1 }
 0x2ba   : > { %v1347_v46 = vmax.f32 %v2929_v44, %v2931_v45 }
 0x2bb   : > { %v2935_v47 = vpop.f32.mrf.mxu1 }
 0x2bc   : > { %1348 = vmax.xlane.f32.xlu1 %v1347_v46 }
 0x2bd   : > { %v2937_v38 = vpop.f32.mrf.mxu1 }
 0x2be   : > { %v1350_v48 = vmax.f32 %v2935_v47, %v2937_v38 }
 0x2bf   : > { %v2941_v49 = vpop.f32.mrf.mxu1 }
 0x2c0   : > { %1351 = vmax.xlane.f32.xlu0 %v1350_v48 }
 0x2c1   : > { %v2943_v50 = vpop.f32.mrf.mxu1 }
 0x2c2   : > { %v1353_v51 = vmax.f32 %v2941_v49, %v2943_v50 }
 0x2c3   : > { %v2947_v52 = vpop.f32.mrf.mxu1 }
 0x2c4   : > { %1354 = vmax.xlane.f32.xlu1 %v1353_v51 }
 0x2c5   : > { %v2949_v53 = vpop.f32.mrf.mxu1 }
 0x2c6   : > { %v1356_v54 = vmax.f32 %v2947_v52, %v2949_v53 }
 0x2c7   : > { %v2953_v55 = vpop.f32.mrf.mxu1 }
 0x2c8   : > { %1357 = vmax.xlane.f32.xlu0 %v1356_v54 }
 0x2c9   : > { %v2955_v56 = vpop.f32.mrf.mxu1 }
 0x2ca   : > { %v1359_v57 = vmax.f32 %v2953_v55, %v2955_v56 }
 0x2cb   : > { %v2959_v58 = vpop.f32.mrf.mxu1 }
 0x2cc   : > { %1360 = vmax.xlane.f32.xlu1 %v1359_v57 }
 0x2cd   : > { %v2961_v59 = vpop.f32.mrf.mxu1 }
 0x2ce   : > { %v1362_v60 = vmax.f32 %v2959_v58, %v2961_v59 }
 0x2cf   : > { %v2965_v61 = vpop.f32.mrf.mxu1 }
 0x2d0   : > { %1363 = vmax.xlane.f32.xlu0 %v1362_v60 }
 0x2d1   : > { %v2967_v62 = vpop.f32.mrf.mxu1 }
 0x2d2   : > { %v1365_v63 = vmax.f32 %v2965_v61, %v2967_v62 }
 0x2d3   : > { %v2971_v0 = vpop.f32.mrf.mxu1 }
 0x2d4   : > { %1366 = vmax.xlane.f32.xlu0 %v1365_v63 }
 0x2d5   : > { %v2973_v1 = vpop.f32.mrf.mxu1 }
 0x2d6   : > { %v1368_v2 = vmax.f32 %v2971_v0, %v2973_v1 }
 0x2d7   : > { %v2977_v3 = vpop.f32.mrf.mxu1 }
 0x2d8   : > { %1369 = vmax.xlane.f32.xlu0 %v1368_v2 }
 0x2d9   : > { %v2979_v4 = vpop.f32.mrf.mxu1 }
 0x2da   : > { %v1371_v5 = vmax.f32 %v2977_v3, %v2979_v4 }
 0x2db   : > { %v2983_v6 = vpop.f32.mrf.mxu1 }
 0x2dc   : > { %1372 = vmax.xlane.f32.xlu0 %v1371_v5 }
 0x2dd   : > { %v2985_v7 = vpop.f32.mrf.mxu1 }
 0x2de   : > { %v1374_v8 = vmax.f32 %v2983_v6, %v2985_v7 }
 0x2df   : > { %v2989_v9 = vpop.f32.mrf.mxu1 }
 0x2e0   : > { %1375 = vmax.xlane.f32.xlu1 %v1374_v8 }
 0x2e1   : > { %v2991_v10 = vpop.f32.mrf.mxu1 }
 0x2e2   : > { %v1377_v11 = vmax.f32 %v2989_v9, %v2991_v10 }
 0x2e3   : > { %v2995_v12 = vpop.f32.mrf.mxu1 }
 0x2e4   : > { %1378 = vmax.xlane.f32.xlu1 %v1377_v11 }
 0x2e5   : > { %v2997_v13 = vpop.f32.mrf.mxu1 }
 0x2e6   : > { %v1380_v14 = vmax.f32 %v2995_v12, %v2997_v13 }
 0x2e7   : > { %v3001_v15 = vpop.f32.mrf.mxu1 }
 0x2e8   : > { %1381 = vmax.xlane.f32.xlu1 %v1380_v14 }
 0x2e9   : > { %v3003_v16 = vpop.f32.mrf.mxu1 }
 0x2ea   : > { %v1383_v17 = vmax.f32 %v3001_v15, %v3003_v16 }
 0x2ec   : > { %1384 = vmax.xlane.f32.xlu1 %v1383_v17 }
 0x339   : > { %v1340_v33 = vpop.xlane.xlu0 %1339 }
 0x33a   : > { %v1386_v36 = vsub.f32 %v2911_v34, %v1340_v33  ;;  %v1387_v40 = vsub.f32 %v2913_v35, %v1340_v33 }
 0x33c   : > { %v1418_v43 = vmul.f32 1.442695, %v1386_v36  ;;  %v1420_v46 = vmul.f32 1.442695, %v1387_v40 }
 0x33d   : > { %v1343_v48 = vpop.xlane.xlu0 %1342 }
 0x33e   : > { %2359 = vpow2.f32 %v1418_v43  ;;  %v1388_v51 = vsub.f32 %v2917_v37, %v1343_v48  ;;  %v1389_v54 = vsub.f32 %v2919_v39, %v1343_v48  ;;  %v1586_v48 = vld [vmem:[#allocation3 + $0x40] sm:$0xff] }
 0x33f   : > { %2361 = vpow2.f32 %v1420_v46  ;;  %2139 = vmatpush3.msra.mxu0 %v1586_v48  ;;  %2305 = vmatpush3.msra.mxu1 %v1586_v48 }
 0x340   : > { %v1422_v57 = vmul.f32 1.442695, %v1388_v51  ;;  %v1424_v60 = vmul.f32 1.442695, %v1389_v54 }
 0x341   : > { %v1346_v63 = vpop.xlane.xlu1 %1345 }
 0x342   : > { %2363 = vpow2.f32 %v1422_v57  ;;  %v1390_v2 = vsub.f32 %v2923_v41, %v1346_v63  ;;  %v1391_v5 = vsub.f32 %v2925_v42, %v1346_v63  ;;  %v1601_v57 = vld [vmem:[#allocation3 + $0xb8] sm:$0xff]  ;;  %v1600_v63 = vld [vmem:[#allocation3 + $0xb0] sm:$0xff] }
 0x343   : > { %2365 = vpow2.f32 %v1424_v60  ;;  %v1585_v60 = vld [vmem:[#allocation3 + $0x38] sm:$0xff]  ;;  %2140 = vmatprep.subr.mxu0 %v1601_v57  ;;  %2290 = vmatprep.subr.mxu1 %v1601_v57 }
 0x344   : > { %v1426_v34 = vmul.f32 1.442695, %v1390_v2  ;;  %v1428_v35 = vmul.f32 1.442695, %v1391_v5  ;;  %2141 = vmatpush3.msra.mxu0 %v1585_v60  ;;  %2306 = vmatpush3.msra.mxu1 %v1585_v60 }
 0x345   : > { %v1349_v8 = vpop.xlane.xlu1 %1348  ;;  %2142 = vmatprep.subr.mxu0 %v1600_v63  ;;  %2291 = vmatprep.subr.mxu1 %v1600_v63 }
 0x346   : > { %2367 = vpow2.f32 %v1426_v34  ;;  %v1392_v11 = vsub.f32 %v2929_v44, %v1349_v8  ;;  %v1393_v37 = vsub.f32 %v2931_v45, %v1349_v8  ;;  %v1584_v8 = vld [vmem:[#allocation3 + $0x30] sm:$0xff] }
 0x347   : > { %2369 = vpow2.f32 %v1428_v35  ;;  %2143 = vmatpush3.msra.mxu0 %v1584_v8  ;;  %2307 = vmatpush3.msra.mxu1 %v1584_v8 }
 0x348   : > { %v1430_v39 = vmul.f32 1.442695, %v1392_v11  ;;  %v1432_v14 = vmul.f32 1.442695, %v1393_v37  ;;  %v1583_v37 = vld [vmem:[#allocation3 + $0x28] sm:$0xff] }
 0x349   : > { %v1352_v17 = vpop.xlane.xlu0 %1351 }
 0x34a   : > { %2371 = vpow2.f32 %v1430_v39  ;;  %v1394_v18 = vsub.f32 %v2935_v47, %v1352_v17  ;;  %v1395_v41 = vsub.f32 %v2937_v38, %v1352_v17  ;;  %v1598_v39 = vld [vmem:[#allocation3 + $0xa0] sm:$0xff] }
 0x34b   : > { %v3017_v19 = vpop.eup %2359  ;;  %2373 = vpow2.f32 %v1432_v14 }
 0x34c   : > { %v3019_v42 = vpop.eup %2361  ;;  %v1434_v20 = vmul.f32 1.442695, %v1394_v18  ;;  %v1436_v21 = vmul.f32 1.442695, %v1395_v41 }
 0x34d   : > { %v1355_v22 = vpop.xlane.xlu1 %1354  ;;  %v1482_v44 = vadd.f32 %v3019_v42, %v3017_v19 }
 0x34e   : > { %2375 = vpow2.f32 %v1434_v20  ;;  %v1396_v45 = vsub.f32 %v2941_v49, %v1355_v22  ;;  %v1397_v23 = vsub.f32 %v2943_v50, %v1355_v22  ;;  %v1582_v22 = vld [vmem:[#allocation3 + $0x20] sm:$0xff] }
 0x34f   : > { %v3025_v24 = vpop.eup %2363  ;;  %2377 = vpow2.f32 %v1436_v21  ;;  %1483 = vadd.xlane.f32.xlu0 %v1482_v44 }
 0x350   : > { %v3027_v47 = vpop.eup %2365  ;;  %v1438_v38 = vmul.f32 1.442695, %v1396_v45  ;;  %v1440_v25 = vmul.f32 1.442695, %v1397_v23  ;;  %v1581_v45 = vld [vmem:[#allocation3 + $0x18] sm:$0xff]  ;;  %v1596_v23 = vld [vmem:[#allocation3 + $0x90] sm:$0xff] }
 0x351   : > { %v1358_v26 = vpop.xlane.xlu0 %1357  ;;  %v1485_v27 = vadd.f32 %v3027_v47, %v3025_v24 }
 0x352   : > { %2379 = vpow2.f32 %v1438_v38  ;;  %v1398_v28 = vsub.f32 %v2947_v52, %v1358_v26  ;;  %v1399_v29 = vsub.f32 %v2949_v53, %v1358_v26 }
 0x353   : > { %v3033_v49 = vpop.eup %2367  ;;  %2381 = vpow2.f32 %v1440_v25  ;;  %1486 = vadd.xlane.f32.xlu1 %v1485_v27 }
 0x354   : > { %v3035_v50 = vpop.eup %2369  ;;  %v1442_v30 = vmul.f32 1.442695, %v1398_v28  ;;  %v1444_v31 = vmul.f32 1.442695, %v1399_v29 }
 0x355   : > { %v1361_v32 = vpop.xlane.xlu1 %1360  ;;  %v1488_v33 = vadd.f32 %v3035_v50, %v3033_v49 }
 0x356   : > { %2383 = vpow2.f32 %v1442_v30  ;;  %v1400_v36 = vsub.f32 %v2953_v55, %v1361_v32  ;;  %v1401_v40 = vsub.f32 %v2955_v56, %v1361_v32  ;;  %v1580_v30 = vld [vmem:[#allocation3 + $0x10] sm:$0xff]  ;;  %v1579_v32 = vld [vmem:[#allocation3 + $0x8] sm:$0xff] }
 0x357   : > { %v3041_v52 = vpop.eup %2371  ;;  %2385 = vpow2.f32 %v1444_v31  ;;  %1489 = vadd.xlane.f32.xlu0 %v1488_v33  ;;  %v1594_v33 = vld [vmem:[#allocation3 + $0x80] sm:$0xff] }
 0x358   : > { %v3043_v53 = vpop.eup %2373  ;;  %v1446_v43 = vmul.f32 1.442695, %v1400_v36  ;;  %v1448_v46 = vmul.f32 1.442695, %v1401_v40 }
 0x359   : > { %v1364_v51 = vpop.xlane.xlu0 %1363  ;;  %v1491_v54 = vadd.f32 %v3043_v53, %v3041_v52 }
 0x35a   : > { %2387 = vpow2.f32 %v1446_v43  ;;  %v1402_v55 = vsub.f32 %v2959_v58, %v1364_v51  ;;  %v1403_v56 = vsub.f32 %v2961_v59, %v1364_v51  ;;  %v1599_v59 = vld [vmem:[#allocation3 + $0xa8] sm:$0xff] }
 0x35b   : > { %v3049_v2 = vpop.eup %2375  ;;  %2389 = vpow2.f32 %v1448_v46  ;;  %1492 = vadd.xlane.f32.xlu1 %v1491_v54  ;;  %2144 = vmatprep.subr.mxu0 %v1599_v59  ;;  %v1578_v54 = vld [vmem:[#allocation3] sm:$0xff] }
 0x35c   : > { %v3051_v5 = vpop.eup %2377  ;;  %v1450_v34 = vmul.f32 1.442695, %v1402_v55  ;;  %v1452_v35 = vmul.f32 1.442695, %v1403_v56  ;;  %2145 = vmatpush3.msra.mxu0 %v1583_v37  ;;  %2292 = vmatprep.subr.mxu1 %v1599_v59 }
 0x35d   : > { %v1367_v11 = vpop.xlane.xlu0 %1366  ;;  %v1494_v58 = vadd.f32 %v3051_v5, %v3049_v2  ;;  %2146 = vmatprep.subr.mxu0 %v1598_v39  ;;  %2308 = vmatpush3.msra.mxu1 %v1583_v37 }
 0x35e   : > { %2391 = vpow2.f32 %v1450_v34  ;;  %v1404_v14 = vsub.f32 %v2965_v61, %v1367_v11  ;;  %v1405_v17 = vsub.f32 %v2967_v62, %v1367_v11  ;;  %2147 = vmatpush3.msra.mxu0 %v1582_v22  ;;  %v1597_v62 = vld [vmem:[#allocation3 + $0x98] sm:$0xff]  ;;  %2293 = vmatprep.subr.mxu1 %v1598_v39 }
 0x35f   : > { %v3057_v18 = vpop.eup %2379  ;;  %2393 = vpow2.f32 %v1452_v35  ;;  %1495 = vadd.xlane.f32.xlu0 %v1494_v58  ;;  %2148 = vmatprep.subr.mxu0 %v1597_v62 }
 0x360   : > { %v3059_v41 = vpop.eup %2381  ;;  %v1454_v20 = vmul.f32 1.442695, %v1404_v14  ;;  %v1456_v21 = vmul.f32 1.442695, %v1405_v17  ;;  %2149 = vmatpush3.msra.mxu0 %v1581_v45  ;;  %2309 = vmatpush3.msra.mxu1 %v1582_v22 }
 0x361   : > { %v1370_v44 = vpop.xlane.xlu0 %1369  ;;  %v1497_v61 = vadd.f32 %v3059_v41, %v3057_v18  ;;  %2150 = vmatprep.subr.mxu0 %v1596_v23  ;;  %2294 = vmatprep.subr.mxu1 %v1597_v62 }
 0x362   : > { %2395 = vpow2.f32 %v1454_v20  ;;  %v1406_v38 = vsub.f32 %v2971_v0, %v1370_v44  ;;  %v1407_v25 = vsub.f32 %v2973_v1, %v1370_v44  ;;  %2151 = vmatpush3.msra.mxu0 %v1580_v30  ;;  %v1595_v1 = vld [vmem:[#allocation3 + $0x88] sm:$0xff]  ;;  %2310 = vmatpush3.msra.mxu1 %v1581_v45 }
 0x363   : > { %v3065_v26 = vpop.eup %2383  ;;  %2397 = vpow2.f32 %v1456_v21  ;;  %1498 = vadd.xlane.f32.xlu1 %v1497_v61  ;;  %2152 = vmatprep.subr.mxu0 %v1595_v1 }
 0x364   : > { %v3067_v27 = vpop.eup %2385  ;;  %v1458_v28 = vmul.f32 1.442695, %v1406_v38  ;;  %v1460_v29 = vmul.f32 1.442695, %v1407_v25  ;;  %2153 = vmatpush3.msra.mxu0 %v1579_v32  ;;  %2295 = vmatprep.subr.mxu1 %v1596_v23 }
 0x365   : > { %v1373_v31 = vpop.xlane.xlu0 %1372  ;;  %v1500_v0 = vadd.f32 %v3067_v27, %v3065_v26  ;;  %2154 = vmatprep.subr.mxu0 %v1594_v33  ;;  %2311 = vmatpush3.msra.mxu1 %v1580_v30 }
 0x366   : > { %2399 = vpow2.f32 %v1458_v28  ;;  %v1408_v36 = vsub.f32 %v2977_v3, %v1373_v31  ;;  %v1409_v40 = vsub.f32 %v2979_v4, %v1373_v31  ;;  %2155 = vmatpush3.msra.mxu0 %v1578_v54  ;;  %2296 = vmatprep.subr.mxu1 %v1595_v1 }
 0x367   : > { %v3073_v43 = vpop.eup %2387  ;;  %2401 = vpow2.f32 %v1460_v29  ;;  %1501 = vadd.xlane.f32.xlu0 %v1500_v0  ;;  %2312 = vmatpush3.msra.mxu1 %v1579_v32 }
 0x368   : > { %v3075_v46 = vpop.eup %2389  ;;  %v1462_v48 = vmul.f32 1.442695, %v1408_v36  ;;  %v1464_v51 = vmul.f32 1.442695, %v1409_v40  ;;  %2297 = vmatprep.subr.mxu1 %v1594_v33 }
 0x369   : > { %v1376_v57 = vpop.xlane.xlu1 %1375  ;;  %v1503_v3 = vadd.f32 %v3075_v46, %v3073_v43  ;;  %2313 = vmatpush3.msra.mxu1 %v1578_v54 }
 0x36a   : > { %2403 = vpow2.f32 %v1462_v48  ;;  %v1410_v4 = vsub.f32 %v2983_v6, %v1376_v57  ;;  %v1411_v60 = vsub.f32 %v2985_v7, %v1376_v57  ;;  %v2035_v48 = vld [vmem:[#allocation4] ss:$0 sm:$0xff] }
 0x36b   : > { %v3081_v63 = vpop.eup %2391  ;;  %2405 = vpow2.f32 %v1464_v51  ;;  %1504 = vadd.xlane.f32.xlu1 %v1503_v3  ;;  %v2513_v51 = vmov 0  }
 0x36c   : > { %v3083_v55 = vpop.eup %2393  ;;  %v1466_v56 = vmul.f32 1.442695, %v1410_v4  ;;  %v1468_v34 = vmul.f32 1.442695, %v1411_v60  ;;  %2358 = vset.pattern.permute.xlu0 %v2513_v51 }
 0x36d   : > { %v1379_v35 = vpop.xlane.xlu1 %1378  ;;  %v1506_v8 = vadd.f32 %v3083_v55, %v3081_v63 }
 0x36e   : > { %2407 = vpow2.f32 %v1466_v56  ;;  %v1412_v6 = vsub.f32 %v2989_v9, %v1379_v35  ;;  %v1413_v7 = vsub.f32 %v2991_v10, %v1379_v35 }
 0x36f   : > { %v3089_v11 = vpop.eup %2395  ;;  %2409 = vpow2.f32 %v1468_v34  ;;  %1507 = vadd.xlane.f32.xlu0 %v1506_v8 }
 0x370   : > { %v3091_v58 = vpop.eup %2397  ;;  %v1470_v59 = vmul.f32 1.442695, %v1412_v6  ;;  %v1472_v37 = vmul.f32 1.442695, %v1413_v7 }
 0x371   : > { %v1382_v39 = vpop.xlane.xlu1 %1381  ;;  %v1509_v14 = vadd.f32 %v3091_v58, %v3089_v11 }
 0x372   : > { %2411 = vpow2.f32 %v1470_v59  ;;  %v1414_v17 = vsub.f32 %v2995_v12, %v1382_v39  ;;  %v1415_v20 = vsub.f32 %v2997_v13, %v1382_v39 }
 0x373   : > { %v3097_v9 = vpop.eup %2399  ;;  %2413 = vpow2.f32 %v1472_v37  ;;  %1510 = vadd.xlane.f32.xlu0 %v1509_v14 }
 0x374   : > { %v3099_v10 = vpop.eup %2401  ;;  %v1474_v21 = vmul.f32 1.442695, %v1414_v17  ;;  %v1476_v22 = vmul.f32 1.442695, %v1415_v20 }
 0x375   : > { %v1385_v44 = vpop.xlane.xlu1 %1384  ;;  %v1512_v61 = vadd.f32 %v3099_v10, %v3097_v9 }
 0x376   : > { %2415 = vpow2.f32 %v1474_v21  ;;  %v1416_v62 = vsub.f32 %v3001_v15, %v1385_v44  ;;  %v1417_v45 = vsub.f32 %v3003_v16, %v1385_v44 }
 0x377   : > { %v3105_v12 = vpop.eup %2403  ;;  %2417 = vpow2.f32 %v1476_v22  ;;  %1513 = vadd.xlane.f32.xlu0 %v1512_v61 }
 0x378   : > { %v3107_v13 = vpop.eup %2405  ;;  %v1478_v23 = vmul.f32 1.442695, %v1416_v62  ;;  %v1480_v38 = vmul.f32 1.442695, %v1417_v45 }
 0x379   : > { %v1515_v25 = vadd.f32 %v3107_v13, %v3105_v12 }
 0x37a   : > { %2419 = vpow2.f32 %v1478_v23 }
 0x37b   : > { %v3111_v28 = vpop.eup %2407  ;;  %2421 = vpow2.f32 %v1480_v38  ;;  %1516 = vadd.xlane.f32.xlu0 %v1515_v25 }
 0x37c   : > { %v3113_v29 = vpop.eup %2409 }
 0x37d   : > { %v1518_v15 = vadd.f32 %v3113_v29, %v3111_v28 }
 0x37f   : > { %v3117_v16 = vpop.eup %2411  ;;  %1519 = vadd.xlane.f32.xlu1 %v1518_v15 }
 0x380   : > { %v3119_v30 = vpop.eup %2413 }
 0x381   : > { %v1521_v31 = vadd.f32 %v3119_v30, %v3117_v16 }
 0x383   : > { %v3123_v0 = vpop.eup %2415  ;;  %1522 = vadd.xlane.f32.xlu1 %v1521_v31 }
 0x384   : > { %v3125_v1 = vpop.eup %2417 }
 0x385   : > { %v1524_v32 = vadd.f32 %v3125_v1, %v3123_v0 }
 0x387   : > { %v3129_v33 = vpop.eup %2419  ;;  %1525 = vadd.xlane.f32.xlu1 %v1524_v32 }
 0x388   : > { %v3131_v36 = vpop.eup %2421 }
 0x389   : > { %v1527_v40 = vadd.f32 %v3131_v36, %v3129_v33 }
 0x38b   : > { %1528 = vadd.xlane.f32.xlu1 %v1527_v40 }
 0x391   : > { %1762 = vperm.xlu0 %2358, %v2035_v48  }
 0x3d8   : > { %v1484_v54 = vpop.xlane.xlu0 %1483 }
 0x3d9   : > { %2423 = vrcp.f32 %v1484_v54 }
 0x3dc   : > { %v1487_v57 = vpop.xlane.xlu1 %1486 }
 0x3dd   : > { %2425 = vrcp.f32 %v1487_v57 }
 0x3e0   : > { %v1490_v3 = vpop.xlane.xlu0 %1489 }
 0x3e1   : > { %2427 = vrcp.f32 %v1490_v3 }
 0x3e4   : > { %v1493_v4 = vpop.xlane.xlu1 %1492 }
 0x3e5   : > { %2429 = vrcp.f32 %v1493_v4 }
 0x3e6   : > { %v2424_v60 = vpop.eup %2423 }
 0x3e7   : > { %v1532_v56 = vmul.f32 %v2424_v60, %v3019_v42  ;;  %v1531_v34 = vmul.f32 %v2424_v60, %v3017_v19 }
 0x3e8   : > { %v1496_v35 = vpop.xlane.xlu0 %1495 }
 0x3e9   : > { %2431 = vrcp.f32 %v1496_v35  ;;  %1674 = vmatprep.mubr.f32.mxu0 %v1532_v56 }
 0x3ea   : > { %v2426_v8 = vpop.eup %2425  ;;  %1675 = vmatmul.mubr.f32.vlgmr.msra.gmra.mxu0 %v1531_v34 }
 0x3eb   : > { %v1535_v6 = vmul.f32 %v2426_v8, %v3027_v47  ;;  %v1534_v7 = vmul.f32 %v2426_v8, %v3025_v24 }
 0x3ec   : > { %v1499_v59 = vpop.xlane.xlu1 %1498 }
 0x3ed   : > { %2433 = vrcp.f32 %v1499_v59  ;;  %1679 = vmatprep.mubr.f32.mxu0 %v1535_v6  ;;  %v2455_v6 = vld [vmem:[%s2605_s27] sm:$0xff] }
 0x3ee   : > { %v2428_v37 = vpop.eup %2427  ;;  %1680 = vmatmul.mubr.f32.gmra.mxu0 %v1534_v7 }
 0x3ef   : > { %v1538_v39 = vmul.f32 %v2428_v37, %v3035_v50  ;;  %v1537_v42 = vmul.f32 %v2428_v37, %v3033_v49 }
 0x3f0   : > { %v1502_v14 = vpop.xlane.xlu0 %1501 }
 0x3f1   : > { %2435 = vrcp.f32 %v1502_v14  ;;  %1684 = vmatprep.mubr.f32.mxu0 %v1538_v39  ;;  %v2456_v39 = vld [vmem:[%s2605_s27 + $0x8] sm:$0xff] }
 0x3f2   : > { %v2430_v19 = vpop.eup %2429  ;;  %1685 = vmatmul.mubr.f32.gmra.mxu0 %v1537_v42 }
 0x3f3   : > { %v1541_v17 = vmul.f32 %v2430_v19, %v3043_v53  ;;  %v1540_v47 = vmul.f32 %v2430_v19, %v3041_v52 }
 0x3f4   : > { %v1505_v20 = vpop.xlane.xlu1 %1504 }
 0x3f5   : > { %2437 = vrcp.f32 %v1505_v20  ;;  %1689 = vmatprep.mubr.f32.mxu0 %v1541_v17  ;;  %v2457_v20 = vld [vmem:[%s2605_s27 + $0x10] sm:$0xff] }
 0x3f6   : > { %v2432_v24 = vpop.eup %2431  ;;  %1690 = vmatmul.mubr.f32.gmra.mxu0 %v1540_v47 }
 0x3f7   : > { %v1544_v21 = vmul.f32 %v2432_v24, %v3051_v5  ;;  %v1543_v50 = vmul.f32 %v2432_v24, %v3049_v2 }
 0x3f8   : > { %v1508_v22 = vpop.xlane.xlu0 %1507 }
 0x3f9   : > { %2439 = vrcp.f32 %v1508_v22  ;;  %1694 = vmatprep.mubr.f32.mxu0 %v1544_v21 }
 0x3fa   : > { %v2434_v49 = vpop.eup %2433  ;;  %1695 = vmatmul.mubr.f32.gmra.mxu0 %v1543_v50 }
 0x3fb   : > { %v1547_v44 = vmul.f32 %v2434_v49, %v3059_v41  ;;  %v1546_v53 = vmul.f32 %v2434_v49, %v3057_v18 }
 0x3fc   : > { %v1511_v61 = vpop.xlane.xlu0 %1510 }
 0x3fd   : > { %2441 = vrcp.f32 %v1511_v61  ;;  %1699 = vmatprep.mubr.f32.mxu0 %v1547_v44  ;;  %v2458_v44 = vld [vmem:[%s2605_s27 + $0x18] sm:$0xff] }
 0x3fe   : > { %v2436_v52 = vpop.eup %2435  ;;  %1700 = vmatmul.mubr.f32.gmra.mxu0 %v1546_v53 }
 0x3ff   : > { %v1550_v62 = vmul.f32 %v2436_v52, %v3067_v27  ;;  %v1549_v5 = vmul.f32 %v2436_v52, %v3065_v26 }
 0x400   : > { %v1514_v45 = vpop.xlane.xlu0 %1513 }
 0x401   : > { %2443 = vrcp.f32 %v1514_v45  ;;  %1704 = vmatprep.mubr.f32.mxu0 %v1550_v62  ;;  %v2459_v45 = vld [vmem:[%s2605_s27 + $0x20] sm:$0xff] }
 0x402   : > { %v2438_v2 = vpop.eup %2437  ;;  %1705 = vmatmul.mubr.f32.gmra.mxu0 %v1549_v5 }
 0x403   : > { %v1553_v23 = vmul.f32 %v2438_v2, %v3075_v46  ;;  %v1552_v41 = vmul.f32 %v2438_v2, %v3073_v43 }
 0x404   : > { %v1517_v38 = vpop.xlane.xlu0 %1516 }
 0x405   : > { %2445 = vrcp.f32 %v1517_v38  ;;  %1709 = vmatprep.mubr.f32.mxu0 %v1553_v23 }
 0x406   : > { %v2440_v18 = vpop.eup %2439  ;;  %1710 = vmatmul.mubr.f32.gmra.mxu0 %v1552_v41 }
 0x407   : > { %v1556_v25 = vmul.f32 %v2440_v18, %v3083_v55  ;;  %v1555_v27 = vmul.f32 %v2440_v18, %v3081_v63 }
 0x408   : > { %v1520_v15 = vpop.xlane.xlu1 %1519 }
 0x409   : > { %2447 = vrcp.f32 %v1520_v15  ;;  %1714 = vmatprep.mubr.f32.mxu0 %v1556_v25  ;;  %v2460_v25 = vld [vmem:[%s2605_s27 + $0x28] sm:$0xff] }
 0x40a   : > { %v2442_v26 = vpop.eup %2441  ;;  %1715 = vmatmul.mubr.f32.gmra.mxu0 %v1555_v27 }
 0x40b   : > { %v1559_v31 = vmul.f32 %v2442_v26, %v3091_v58  ;;  %v1558_v46 = vmul.f32 %v2442_v26, %v3089_v11 }
 0x40c   : > { %v1523_v32 = vpop.xlane.xlu1 %1522  ;;  %v3167_v34 = vpop.permute.xlu0 %1762 }
 0x40d   : > { %2449 = vrcp.f32 %v1523_v32  ;;  %1719 = vmatprep.mubr.f32.mxu0 %v1559_v31  ;;  %v2461_v32 = vld [vmem:[%s2605_s27 + $0x30] sm:$0xff] }
 0x40e   : > { %v2444_v43 = vpop.eup %2443  ;;  %1720 = vmatmul.mubr.f32.gmra.mxu0 %v1558_v46 }
 0x40f   : > { %v1562_v40 = vmul.f32 %v2444_v43, %v3099_v10  ;;  %v1561_v55 = vmul.f32 %v2444_v43, %v3097_v9 }
 0x410   : > { %v1526_v48 = vpop.xlane.xlu1 %1525 }
 0x411   : > { %2451 = vrcp.f32 %v1526_v48  ;;  %1724 = vmatprep.mubr.f32.mxu0 %v1562_v40 }
 0x412   : > { %v2446_v63 = vpop.eup %2445  ;;  %1725 = vmatmul.mubr.f32.gmra.mxu0 %v1561_v55 }
 0x413   : > { %v1565_v51 = vmul.f32 %v2446_v63, %v3107_v13  ;;  %v1564_v58 = vmul.f32 %v2446_v63, %v3105_v12 }
 0x414   : > { %v1529_v54 = vpop.xlane.xlu1 %1528 }
 0x415   : > { %2453 = vrcp.f32 %v1529_v54  ;;  %1729 = vmatprep.mubr.f32.mxu0 %v1565_v51  ;;  %v2462_v51 = vld [vmem:[%s2605_s27 + $0x38] sm:$0xff] }
 0x416   : > { %v2448_v11 = vpop.eup %2447  ;;  %1730 = vmatmul.mubr.f32.gmra.mxu0 %v1564_v58 }
 0x417   : > { %v1568_v57 = vmul.f32 %v2448_v11, %v3113_v29  ;;  %v1567_v10 = vmul.f32 %v2448_v11, %v3111_v28 }
 0x419   : > { %1734 = vmatprep.mubr.f32.mxu1 %v1568_v57 }
 0x41a   : > { %v2450_v9 = vpop.eup %2449  ;;  %1735 = vmatmul.mubr.f32.vlgmr.msra.gmra.mxu1 %v1567_v10 }
 0x41b   : > { %v1571_v3 = vmul.f32 %v2450_v9, %v3119_v30  ;;  %v1570_v4 = vmul.f32 %v2450_v9, %v3117_v16  ;;  %v2463_v9 = vld [vmem:[%s2605_s27 + $0x40] sm:$0xff] }
 0x41d   : > { %1739 = vmatprep.mubr.f32.mxu1 %v1571_v3 }
 0x41e   : > { %v2452_v13 = vpop.eup %2451  ;;  %1740 = vmatmul.mubr.f32.gmra.mxu1 %v1570_v4 }
 0x41f   : > { %v1574_v12 = vmul.f32 %v2452_v13, %v3125_v1  ;;  %v1573_v60 = vmul.f32 %v2452_v13, %v3123_v0 }
 0x421   : > { %1744 = vmatprep.mubr.f32.mxu1 %v1574_v12 }
 0x422   : > { %v2454_v56 = vpop.eup %2453  ;;  %1745 = vmatmul.mubr.f32.gmra.mxu1 %v1573_v60 }
 0x423   : > { %v1577_v28 = vmul.f32 %v2454_v56, %v3131_v36  ;;  %v1576_v29 = vmul.f32 %v2454_v56, %v3129_v33  ;;  %v2464_v56 = vld [vmem:[%s2605_s27 + $0x48] sm:$0xff] }
 0x425   : > { %1749 = vmatprep.mubr.f32.mxu1 %v1577_v28 }
 0x426   : > { %1750 = vmatmul.mubr.f32.gmra.mxu1 %v1576_v29 }
 0x4aa   : > { %v2156_v16 = vpop.f32.mrf.mxu0 }
 0x4ac   : > { %v2157_v30 = vpop.f32.mrf.mxu0 }
 0x4ad   : > { %v2158_v1 = vadd.f32 %v2157_v30, %v2156_v16 }
 0x4ae   : > { %v2159_v35 = vpop.f32.mrf.mxu0 }
 0x4af   : > { %v1765_v0 = vmul.f32 %v2158_v1, %v3167_v34 }
 0x4b0   : > { %v2160_v8 = vpop.f32.mrf.mxu0 }
 0x4b1   : > { %v1781_v7 = vadd.f32 %v2455_v6, %v1765_v0  ;;  %v2161_v59 = vadd.f32 %v2160_v8, %v2159_v35  ;;  %v2465_v35 = vld [vmem:[%s2605_s27 + $0x50] sm:$0xff] }
 0x4b2   : > { %v2162_v36 = vpop.f32.mrf.mxu0 }
 0x4b3   : > { %1797 = vst.msk [vmem:[%s2610_s30] sm:$0xff] %vm916_vm1, %v1781_v7  ;;  %v1766_v33 = vmul.f32 %v2161_v59, %v3167_v34 }
 0x4b4   : > { %v2163_v37 = vpop.f32.mrf.mxu0 }
 0x4b5   : > { %v1782_v42 = vadd.f32 %v2456_v39, %v1766_v33  ;;  %v2164_v14 = vadd.f32 %v2163_v37, %v2162_v36  ;;  %v2466_v36 = vld [vmem:[%s2605_s27 + $0x58] sm:$0xff] }
 0x4b6   : > { %v2165_v19 = vpop.f32.mrf.mxu0 }
 0x4b7   : > { %1798 = vst.msk [vmem:[%s2610_s30 + $0x8] sm:$0xff] %vm916_vm1, %v1782_v42  ;;  %v1767_v17 = vmul.f32 %v2164_v14, %v3167_v34 }
 0x4b8   : > { %v2166_v47 = vpop.f32.mrf.mxu0 }
 0x4b9   : > { %v1783_v24 = vadd.f32 %v2457_v20, %v1767_v17  ;;  %v2167_v21 = vadd.f32 %v2166_v47, %v2165_v19  ;;  %v2467_v19 = vld [vmem:[%s2605_s27 + $0x60] sm:$0xff] }
 0x4ba   : > { %v2168_v50 = vpop.f32.mrf.mxu0 }
 0x4bb   : > { %1799 = vst.msk [vmem:[%s2610_s30 + $0x10] sm:$0xff] %vm916_vm1, %v1783_v24  ;;  %v1768_v22 = vmul.f32 %v2167_v21, %v3167_v34 }
 0x4bc   : > { %v2169_v49 = vpop.f32.mrf.mxu0 }
 0x4bd   : > { %v1784_v53 = vadd.f32 %v2458_v44, %v1768_v22  ;;  %v2170_v61 = vadd.f32 %v2169_v49, %v2168_v50  ;;  %v2468_v50 = vld [vmem:[%s2605_s27 + $0x68] sm:$0xff] }
 0x4be   : > { %v2171_v52 = vpop.f32.mrf.mxu0 }
 0x4bf   : > { %1800 = vst.msk [vmem:[%s2610_s30 + $0x18] sm:$0xff] %vm916_vm1, %v1784_v53  ;;  %v1769_v62 = vmul.f32 %v2170_v61, %v3167_v34 }
 0x4c0   : > { %v2172_v5 = vpop.f32.mrf.mxu0 }
 0x4c1   : > { %v1785_v2 = vadd.f32 %v2459_v45, %v1769_v62  ;;  %v2173_v23 = vadd.f32 %v2172_v5, %v2171_v52  ;;  %v2469_v52 = vld [vmem:[%s2605_s27 + $0x70] sm:$0xff] }
 0x4c2   : > { %v2174_v41 = vpop.f32.mrf.mxu0 }
 0x4c3   : > { %1801 = vst.msk [vmem:[%s2610_s30 + $0x20] sm:$0xff] %vm916_vm1, %v1785_v2  ;;  %v1770_v38 = vmul.f32 %v2173_v23, %v3167_v34  ;;  %v2470_v2 = vld [vmem:[%s2605_s27 + $0x78] sm:$0xff] }
 0x4c4   : > { %v2175_v18 = vpop.f32.mrf.mxu0 }
 0x4c5   : > { %v1786_v27 = vadd.f32 %v2460_v25, %v1770_v38  ;;  %v2176_v15 = vadd.f32 %v2175_v18, %v2174_v41 }
 0x4c6   : > { %v2177_v26 = vpop.f32.mrf.mxu0 }
 0x4c7   : > { %1802 = vst.msk [vmem:[%s2610_s30 + $0x28] sm:$0xff] %vm916_vm1, %v1786_v27  ;;  %v1771_v31 = vmul.f32 %v2176_v15, %v3167_v34 }
 0x4c8   : > { %v2178_v46 = vpop.f32.mrf.mxu0 }
 0x4c9   : > { %v1787_v43 = vadd.f32 %v2461_v32, %v1771_v31  ;;  %v2179_v40 = vadd.f32 %v2178_v46, %v2177_v26 }
 0x4ca   : > { %v2180_v55 = vpop.f32.mrf.mxu0 }
 0x4cb   : > { %1803 = vst.msk [vmem:[%s2610_s30 + $0x30] sm:$0xff] %vm916_vm1, %v1787_v43  ;;  %v1772_v48 = vmul.f32 %v2179_v40, %v3167_v34 }
 0x4cc   : > { %v2181_v63 = vpop.f32.mrf.mxu0 }
 0x4cd   : > { %v1788_v58 = vadd.f32 %v2462_v51, %v1772_v48  ;;  %v2182_v54 = vadd.f32 %v2181_v63, %v2180_v55 }
 0x4ce   : > { %v2183_v11 = vpop.f32.mrf.mxu0 }
 0x4cf   : > { %1804 = vst.msk [vmem:[%s2610_s30 + $0x38] sm:$0xff] %vm916_vm1, %v1788_v58  ;;  %v1773_v57 = vmul.f32 %v2182_v54, %v3167_v34 }
 0x4d0   : > { %v2184_v10 = vpop.f32.mrf.mxu0 }
 0x4d1   : > { %v1789_v3 = vadd.f32 %v2463_v9, %v1773_v57  ;;  %v2185_v4 = vadd.f32 %v2184_v10, %v2183_v11 }
 0x4d2   : > { %v2186_v13 = vpop.f32.mrf.mxu0 }
 0x4d3   : > { %1805 = vst.msk [vmem:[%s2610_s30 + $0x40] sm:$0xff] %vm916_vm1, %v1789_v3  ;;  %v1774_v12 = vmul.f32 %v2185_v4, %v3167_v34 }
 0x4d4   : > { %v2187_v60 = vpop.f32.mrf.mxu0 }
 0x4d5   : > { %v1790_v28 = vadd.f32 %v2464_v56, %v1774_v12  ;;  %v2188_v29 = vadd.f32 %v2187_v60, %v2186_v13 }
 0x4d6   : > { %v2189_v16 = vpop.f32.mrf.mxu0 }
 0x4d7   : > { %1806 = vst.msk [vmem:[%s2610_s30 + $0x48] sm:$0xff] %vm916_vm1, %v1790_v28  ;;  %v1775_v30 = vmul.f32 %v2188_v29, %v3167_v34 }
 0x4d8   : > { %v2190_v1 = vpop.f32.mrf.mxu0 }
 0x4d9   : > { %v1791_v0 = vadd.f32 %v2465_v35, %v1775_v30  ;;  %v2191_v8 = vadd.f32 %v2190_v1, %v2189_v16 }
 0x4da   : > { %v2192_v6 = vpop.f32.mrf.mxu1 }
 0x4db   : > { %1807 = vst.msk [vmem:[%s2610_s30 + $0x50] sm:$0xff] %vm916_vm1, %v1791_v0  ;;  %v1776_v7 = vmul.f32 %v2191_v8, %v3167_v34 }
 0x4dc   : > { %v2193_v59 = vpop.f32.mrf.mxu1 }
 0x4dd   : > { %v1792_v33 = vadd.f32 %v2466_v36, %v1776_v7  ;;  %v2194_v37 = vadd.f32 %v2193_v59, %v2192_v6 }
 0x4de   : > { %v2195_v39 = vpop.f32.mrf.mxu1 }
 0x4df   : > { %1808 = vst.msk [vmem:[%s2610_s30 + $0x58] sm:$0xff] %vm916_vm1, %v1792_v33  ;;  %v1777_v42 = vmul.f32 %v2194_v37, %v3167_v34 }
 0x4e0   : > { %v2196_v14 = vpop.f32.mrf.mxu1 }
 0x4e1   : > { %v1793_v17 = vadd.f32 %v2467_v19, %v1777_v42  ;;  %v2197_v47 = vadd.f32 %v2196_v14, %v2195_v39 }
 0x4e2   : > { %v2198_v20 = vpop.f32.mrf.mxu1 }
 0x4e3   : > { %1809 = vst.msk [vmem:[%s2610_s30 + $0x60] sm:$0xff] %vm916_vm1, %v1793_v17  ;;  %v1778_v24 = vmul.f32 %v2197_v47, %v3167_v34 }
 0x4e4   : > { %v2199_v21 = vpop.f32.mrf.mxu1 }
 0x4e5   : > { %v1794_v22 = vadd.f32 %v2468_v50, %v1778_v24  ;;  %v2200_v49 = vadd.f32 %v2199_v21, %v2198_v20 }
 0x4e6   : > { %v2201_v44 = vpop.f32.mrf.mxu1 }
 0x4e7   : > { %1810 = vst.msk [vmem:[%s2610_s30 + $0x68] sm:$0xff] %vm916_vm1, %v1794_v22  ;;  %v1779_v53 = vmul.f32 %v2200_v49, %v3167_v34 }
 0x4e8   : > { %v2202_v61 = vpop.f32.mrf.mxu1 }
 0x4e9   : > { %v1795_v62 = vadd.f32 %v2469_v52, %v1779_v53  ;;  %v2203_v5 = vadd.f32 %v2202_v61, %v2201_v44 }
 0x4eb   : > { %1811 = vst.msk [vmem:[%s2610_s30 + $0x70] sm:$0xff] %vm916_vm1, %v1795_v62  ;;  %v1780_v45 = vmul.f32 %v2203_v5, %v3167_v34 }
 0x4ed   : > { %v1796_v23 = vadd.f32 %v2470_v2, %v1780_v45 }
 0x4ef   : > { %1812 = vst.msk [vmem:[%s2610_s30 + $0x78] sm:$0xff] %vm916_vm1, %v1796_v23 }
 0x4f0 PF: > { %s21_s15 = sadd.s32 1, %s2509_s15   ;;  %s3258_s11 = smov %s2501_s13 }
 0x4f1   : > { %p18_p8 = scmp.ge.s32.totalorder %s21_s15, 6   ;;  %s3259_s12 = smov %s2505_s14 }
 0x4f2   : > { %s3260_s13 = smov %s3263_s8  ;;  %s3261_s14 = smov %s3267_s16 }
 0x4f3   :  { %20 = sbr.rel (!%p18_p8) target bundleno = 3 (0x3), region = 93 }

</bundles_post_ra>
